<compile_context>
chip_gen: v7x
topology: tpu7x:2x2x1
jax: 0.10.0
libtpu: 0.0.40
codegen_flags: <defaults>
</compile_context>

<pallas_src>
import functools
import numpy as np
import jax
import jax.numpy as jnp
from jax import lax
from jax.experimental import pallas as pl
from jax.experimental.pallas import tpu as pltpu


def _round_up(x, m):
    return (x + m - 1) // m * m


# ---------------------------------------------------------------------------
# Pallas kernel: tiled matmul + bias + optional residual + ReLU.
# Statically specialized on:
#   has_residual : fuse an (M, N) residual add before the ReLU
#   use_mask     : per-channel ReLU mask row (1 -> ReLU, 0 -> linear); lets the
#                  conv1(+ReLU) and the linear downsample conv share one call
#   multi_k      : K is tiled -> 3-D grid with a float32 VMEM accumulator;
#                  otherwise a streamlined 2-D grid with no scratch.
# ---------------------------------------------------------------------------
def _fused_matmul_kernel(*refs, has_residual, use_mask, multi_k):
    it = iter(refs)
    p_ref, w_ref, b_ref = next(it), next(it), next(it)
    m_ref = next(it) if use_mask else None
    r_ref = next(it) if has_residual else None
    o_ref = next(it)
    acc_ref = next(it) if multi_k else None

    def epilogue(acc):
        out = acc + b_ref[...]
        if has_residual:
            out = out + r_ref[...]
        if use_mask:
            # per-channel ReLU mask (1 -> ReLU, 0 -> linear)
            out = jnp.where(m_ref[...] > 0.0, jnp.maximum(out, 0.0), out)
        else:
            out = jnp.maximum(out, 0.0)
        o_ref[...] = out.astype(o_ref.dtype)

    if multi_k:
        k = pl.program_id(2)

        @pl.when(k == 0)
        def _():
            acc_ref[...] = jnp.zeros_like(acc_ref)

        acc_ref[...] += jnp.dot(p_ref[...], w_ref[...],
                                preferred_element_type=jnp.float32)

        @pl.when(k == pl.num_programs(2) - 1)
        def _():
            epilogue(acc_ref[...])
    else:
        epilogue(jnp.dot(p_ref[...], w_ref[...],
                         preferred_element_type=jnp.float32))


def fused_conv_matmul(patches, w_flat, bias, relu_mask=None, residual=None,
                      tm=512, tn=128, tk=512):
    """relu( patches @ w_flat + bias [+ residual] ); ReLU optionally per-channel."""
    M, K = patches.shape
    Cout = w_flat.shape[1]
    use_mask = relu_mask is not None
    has_residual = residual is not None

    # M tile: whole M (padded to a sublane multiple) when it fits one tile,
    # otherwise fixed tm tiles.
    if M <= tm:
        TM = _round_up(M, 8)
        Mp = TM
    else:
        TM = tm
        Mp = _round_up(M, TM)
    # K: single 128-padded tile when it fits (2-D grid, no accumulator),
    # otherwise 128-multiple tiles with a 3-D reduction grid.
    if K <= tk:
        Kp = _round_up(K, 128)
        TK = Kp
        multi_k = False
    else:
        TK = tk
        Kp = _round_up(K, TK)
        multi_k = True
    # N (Cout): pad to a lane-dense multiple of 128 (unmasked vst stores).
    TN = min(tn, _round_up(Cout, 128))
    Np = _round_up(Cout, TN)

    patches = jnp.pad(patches, ((0, Mp - M), (0, Kp - K)))
    w_flat = jnp.pad(w_flat, ((0, Kp - K), (0, Np - Cout)))
    bias = jnp.pad(bias, (0, Np - Cout)).reshape(1, Np)

    if multi_k:
        grid = (Mp // TM, Np // TN, Kp // TK)
        pmap_ = lambda i, j, k: (i, k)
        wmap_ = lambda i, j, k: (k, j)
        rowmap = lambda i, j, k: (0, j)
        omap_ = lambda i, j, k: (i, j)
        semantics = ("parallel", "parallel", "arbitrary")
        scratch = [pltpu.VMEM((TM, TN), jnp.float32)]
    else:
        grid = (Mp // TM, Np // TN)
        pmap_ = lambda i, j: (i, 0)
        wmap_ = lambda i, j: (0, j)
        rowmap = lambda i, j: (0, j)
        omap_ = lambda i, j: (i, j)
        semantics = ("parallel", "parallel")
        scratch = []

    in_specs = [
        pl.BlockSpec((TM, TK), pmap_),
        pl.BlockSpec((TK, TN), wmap_),
        pl.BlockSpec((1, TN), rowmap),
    ]
    args = [patches, w_flat, bias]
    if use_mask:
        relu_mask = jnp.pad(relu_mask, (0, Np - Cout)).reshape(1, Np)
        in_specs.append(pl.BlockSpec((1, TN), rowmap))
        args.append(relu_mask)
    if has_residual:
        residual = jnp.pad(residual, ((0, Mp - M), (0, Np - Cout)))
        in_specs.append(pl.BlockSpec((TM, TN), omap_))
        args.append(residual)

    kernel = functools.partial(_fused_matmul_kernel, has_residual=has_residual,
                               use_mask=use_mask, multi_k=multi_k)
    out = pl.pallas_call(
        kernel,
        out_shape=jax.ShapeDtypeStruct((Mp, Np), jnp.float32),
        grid_spec=pltpu.PrefetchScalarGridSpec(
            num_scalar_prefetch=0,
            grid=grid,
            in_specs=in_specs,
            out_specs=pl.BlockSpec((TM, TN), omap_),
            scratch_shapes=scratch,
        ),
        compiler_params=pltpu.CompilerParams(
            dimension_semantics=semantics,
            vmem_limit_bytes=32 * 1024 * 1024,
        ),
    )(*args)
    return out[:M, :Cout]


# ---------------------------------------------------------------------------
# JAX glue: padding + im2col (matches F.pad(..., mode='circular') on H and the
# conv's own zero padding=(0,1) on W)
# ---------------------------------------------------------------------------
def ring_pad(x):
    # x: (N, H, W, C) -> (N, H+2, W+2, C); H padded circularly, W padded with 0
    x = jnp.concatenate([x[:, -1:, :, :], x, x[:, :1, :, :]], axis=1)
    return jnp.pad(x, ((0, 0), (0, 0), (1, 1), (0, 0)))


def im2col(xp, Ho, Wo, stride):
    # xp: (N, Hp, Wp, C) padded input -> (N*Ho*Wo, 9*C); K index = (kh*3+kw)*C + ci
    N, _, _, C = xp.shape
    cols = []
    for kh in range(3):
        for kw in range(3):
            cols.append(
                xp[:, kh:kh + Ho * stride:stride, kw:kw + Wo * stride:stride, :]
            )
    patches = jnp.stack(cols, axis=3)            # (N, Ho, Wo, 9, C)
    return patches.reshape(N * Ho * Wo, 9 * C)


# ---------------------------------------------------------------------------
# RingBasicBlock forward (Pallas path); BN is eval-mode, folded into weights.
# ---------------------------------------------------------------------------
def ring_block_pallas(x, p, stride):
    N, H, W, Cin = x.shape
    Cout = p["w1"].shape[-1]
    Ho = (H - 1) // stride + 1
    Wo = (W - 1) // stride + 1
    M = N * Ho * Wo

    xp = ring_pad(x)                         # circular-H / zero-W padded input
    p1 = im2col(xp, Ho, Wo, stride)          # (M, 9*Cin)

    # Fold BN scale into conv weights -> kernel only needs a bias row.
    w1f = (p["w1"] * p["scale1"]).reshape(9 * Cin, Cout)

    if "wd" in p:
        # Fused conv1(+BN+ReLU) and downsample conv (bias, no BN/ReLU): they
        # read the same patch matrix, so concatenate along Cout.
        wdf = p["wd"].reshape(9 * Cin, Cout)
        w_cat = jnp.concatenate([w1f, wdf], axis=1)           # (9*Cin, 2*Cout)
        b_cat = jnp.concatenate([p["bias1"], p["bd"]])
        m_cat = jnp.concatenate([jnp.ones((Cout,), jnp.float32),
                                 jnp.zeros((Cout,), jnp.float32)])
        both = fused_conv_matmul(p1, w_cat, b_cat, relu_mask=m_cat)  # (M, 2*Cout)
        out1 = both[:, :Cout]
        identity = both[:, Cout:]
    else:
        out1 = fused_conv_matmul(p1, w1f, p["bias1"])          # (M, Cout)
        identity = x.reshape(M, Cout)                           # Cin == Cout

    # conv2 + BN + residual add + ReLU (all fused in one pallas_call)
    op = ring_pad(out1.reshape(N, Ho, Wo, Cout))
    p2 = im2col(op, Ho, Wo, 1)                                   # (M, 9*Cout)
    w2f = (p["w2"] * p["scale2"]).reshape(9 * Cout, Cout)
    out2 = fused_conv_matmul(p2, w2f, p["bias2"], residual=identity)
    return out2.reshape(N, Ho, Wo, Cout)


# ---------------------------------------------------------------------------
# Pure-JAX reference block (lax.conv, unfolded BN) for correctness check
# ---------------------------------------------------------------------------
def ring_block_ref(x, p, stride):
    dn = ("NHWC", "HWIO", "NHWC")
    xp = ring_pad(x)
    out = lax.conv_general_dilated(
        xp, p["w1"], (stride, stride), "VALID", dimension_numbers=dn)
    out = jnp.maximum(out * p["scale1"] + p["bias1"], 0.0)

    if "wd" in p:
        identity = lax.conv_general_dilated(
            xp, p["wd"], (stride, stride), "VALID", dimension_numbers=dn) + p["bd"]
    else:
        identity = x

    op = ring_pad(out)
    out2 = lax.conv_general_dilated(
        op, p["w2"], (1, 1), "VALID", dimension_numbers=dn)
    out2 = out2 * p["scale2"] + p["bias2"] + identity
    return jnp.maximum(out2, 0.0)


# ---------------------------------------------------------------------------
# RingResNet forward
# ---------------------------------------------------------------------------
def ring_resnet_forward(x_nhwc, params, strides, block_fn):
    feats = []
    x = x_nhwc
    for stage_params, s in zip(params, strides):
        for bi, bp in enumerate(stage_params):
            x = block_fn(x, bp, s if bi == 0 else 1)
        feats.append(x)          # backbone_output_ids defaults to all stages
    return feats


# ---------------------------------------------------------------------------
# Deterministic parameter initialization (synthetic; eval-mode BN folded)
# ---------------------------------------------------------------------------
def init_block_params(key, cin, cout, has_downsample):
    ks = jax.random.split(key, 12)

    def conv_w(k, ci, co):
        return jax.random.normal(k, (3, 3, ci, co), jnp.float32) / np.sqrt(9 * ci)

    def bn(kg, kb, km, kv, co):
        g = 1.0 + 0.1 * jax.random.normal(kg, (co,), jnp.float32)
        b = 0.1 * jax.random.normal(kb, (co,), jnp.float32)
        m = 0.1 * jax.random.normal(km, (co,), jnp.float32)
        v = 1.0 + 0.1 * jax.random.uniform(kv, (co,), jnp.float32)
        scale = g / jnp.sqrt(v + 1e-5)
        bias = b - m * scale
        return scale, bias

    p = {"w1": conv_w(ks[0], cin, cout), "w2": conv_w(ks[5], cout, cout)}
    p["scale1"], p["bias1"] = bn(ks[1], ks[2], ks[3], ks[4], cout)
    p["scale2"], p["bias2"] = bn(ks[6], ks[7], ks[8], ks[9], cout)
    if has_downsample:
        p["wd"] = conv_w(ks[10], cin, cout)
        p["bd"] = 0.1 * jax.random.normal(ks[11], (cout,), jnp.float32)
    return p


def init_ring_resnet_params(key, numC_input, num_layer, stride):
    num_channels = [numC_input * 2 ** (i + 1) for i in range(len(num_layer))]
    params = []
    curr = numC_input
    keys = jax.random.split(key, sum(num_layer))
    ki = 0
    for i in range(len(num_layer)):
        stage = [init_block_params(keys[ki], curr, num_channels[i], True)]
        ki += 1
        curr = num_channels[i]
        for _ in range(num_layer[i] - 1):
            stage.append(init_block_params(keys[ki], curr, curr, False))
            ki += 1
        params.append(stage)
    return params


# ---------------------------------------------------------------------------
if __name__ == "__main__":
    # TODO(synk): with_cp (torch.utils.checkpoint) is a training-time memory
    # optimization with no effect on forward values; not reproduced here.
    N, C, H, W = 2, 4, 16, 16
    num_layer = [2, 2, 2]
    strides = (2, 2, 2)

    x_nchw = jax.random.normal(jax.random.PRNGKey(0), (N, C, H, W), jnp.float32)
    x_nhwc = jnp.transpose(x_nchw, (0, 2, 3, 1))

    params = init_ring_resnet_params(jax.random.PRNGKey(1), C, num_layer, strides)

    fwd_pallas = jax.jit(
        lambda x, ps: ring_resnet_forward(x, ps, strides, ring_block_pallas))
    fwd_ref = jax.jit(
        lambda x, ps: ring_resnet_forward(x, ps, strides, ring_block_ref))

    feats = jax.block_until_ready(fwd_pallas(x_nhwc, params))
    feats_ref = jax.block_until_ready(fwd_ref(x_nhwc, params))

    for a, b in zip(feats, feats_ref):
        assert a.shape == b.shape
        assert jnp.allclose(a, b, atol=1e-3, rtol=1e-3), "mismatch vs reference"

    # Convert to NCHW to match the PyTorch module's output convention.
    feats_nchw = [jnp.transpose(f, (0, 3, 1, 2)) for f in feats]
    jax.block_until_ready(feats_nchw)
    print("KERNEL_OK")
</pallas_src>

<mosaic_0001>
module attributes {stable_mosaic.version = 11 : i64} {
  func.func @_fused_matmul_kernel(%arg0: i32, %arg1: i32, %arg2: memref<128x128xf32, #tpu.memory_space<vmem>>, %arg3: memref<128x128xf32, #tpu.memory_space<vmem>>, %arg4: memref<1x128xf32, #tpu.memory_space<vmem>>, %arg5: memref<1x128xf32, #tpu.memory_space<vmem>>, %arg6: memref<128x128xf32, #tpu.memory_space<vmem>>) attributes {dimension_semantics = [#tpu.dimension_semantics<parallel>, #tpu.dimension_semantics<parallel>], iteration_bounds = array<i64: 1, 1>, scalar_prefetch = 0 : i64, scratch_operands = 0 : i64, tpu.core_type = #tpu.core_type<tc>, window_params = [{transform_indices = @transform_0, window_bounds = array<i64: 128, 128>}, {transform_indices = @transform_1, window_bounds = array<i64: 128, 128>}, {transform_indices = @transform_2, window_bounds = array<i64: 1, 128>}, {transform_indices = @transform_3, window_bounds = array<i64: 1, 128>}, {transform_indices = @transform_4, window_bounds = array<i64: 128, 128>}]} {
    %c0 = arith.constant 0 : index
    %c0_0 = arith.constant 0 : index
    %0 = vector.load %arg2[%c0, %c0_0] : memref<128x128xf32, #tpu.memory_space<vmem>>, vector<128x128xf32>
    %c0_1 = arith.constant 0 : index
    %c0_2 = arith.constant 0 : index
    %1 = vector.load %arg3[%c0_1, %c0_2] : memref<128x128xf32, #tpu.memory_space<vmem>>, vector<128x128xf32>
    %cst = arith.constant dense<0.000000e+00> : vector<128x128xf32>
    %2 = tpu.matmul %0, %1, %cst {dimension_numbers = #tpu.dot_dimension_numbers<[1], [0], [0], [1], [0, 0, 1, 1], [], []>} : vector<128x128xf32>, vector<128x128xf32>, vector<128x128xf32> -> vector<128x128xf32>
    %c0_3 = arith.constant 0 : index
    %c0_4 = arith.constant 0 : index
    %3 = vector.load %arg4[%c0_3, %c0_4] : memref<1x128xf32, #tpu.memory_space<vmem>>, vector<1x128xf32>
    %4 = vector.broadcast %3 : vector<1x128xf32> to vector<128x128xf32>
    %5 = arith.addf %2, %4 : vector<128x128xf32>
    %c0_5 = arith.constant 0 : index
    %c0_6 = arith.constant 0 : index
    %6 = vector.load %arg5[%c0_5, %c0_6] : memref<1x128xf32, #tpu.memory_space<vmem>>, vector<1x128xf32>
    %cst_7 = arith.constant 0.000000e+00 : f32
    %7 = vector.broadcast %cst_7 : f32 to vector<1x128xf32>
    %8 = arith.cmpf ogt, %6, %7 : vector<1x128xf32>
    %cst_8 = arith.constant 0.000000e+00 : f32
    %9 = vector.broadcast %cst_8 : f32 to vector<128x128xf32>
    %10 = arith.maximumf %5, %9 : vector<128x128xf32>
    %11 = vector.shape_cast %8 : vector<1x128xi1> to vector<1x128xi1>
    %12 = vector.broadcast %11 : vector<1x128xi1> to vector<128x128xi1>
    %13 = arith.select %12, %10, %5 : vector<128x128xi1>, vector<128x128xf32>
    %c0_9 = arith.constant 0 : index
    %c0_10 = arith.constant 0 : index
    %14 = vector.load %arg6[%c0_9, %c0_10] : memref<128x128xf32, #tpu.memory_space<vmem>>, vector<128x128xf32>
    tpu.vector_store %arg6[%c0_9, %c0_10], %13 {strides = array<i32>} : memref<128x128xf32, #tpu.memory_space<vmem>>, vector<128x128xf32>,
    return
  }
  func.func @transform_0(%arg0: i32, %arg1: i32) -> (i32, i32) {
    %c0_i32 = arith.constant 0 : i32
    %c0_i32_0 = arith.constant 0 : i32
    return %arg0, %c0_i32 : i32, i32
  }
  func.func @transform_1(%arg0: i32, %arg1: i32) -> (i32, i32) {
    %c0_i32 = arith.constant 0 : i32
    %c0_i32_0 = arith.constant 0 : i32
    return %c0_i32, %arg1 : i32, i32
  }
  func.func @transform_2(%arg0: i32, %arg1: i32) -> (i32, i32) {
    %c0_i32 = arith.constant 0 : i32
    %c0_i32_0 = arith.constant 0 : i32
    return %c0_i32, %arg1 : i32, i32
  }
  func.func @transform_3(%arg0: i32, %arg1: i32) -> (i32, i32) {
    %c0_i32 = arith.constant 0 : i32
    %c0_i32_0 = arith.constant 0 : i32
    return %c0_i32, %arg1 : i32, i32
  }
  func.func @transform_4(%arg0: i32, %arg1: i32) -> (i32, i32) {
    %c0_i32 = arith.constant 0 : i32
    return %arg0, %arg1 : i32, i32
  }
}

module attributes {stable_mosaic.version = 11 : i64} {
  func.func @_fused_matmul_kernel(%arg0: i32, %arg1: i32, %arg2: memref<128x128xf32, #tpu.memory_space<vmem>>, %arg3: memref<128x128xf32, #tpu.memory_space<vmem>>, %arg4: memref<1x128xf32, #tpu.memory_space<vmem>>, %arg5: memref<128x128xf32, #tpu.memory_space<vmem>>, %arg6: memref<128x128xf32, #tpu.memory_space<vmem>>) attributes {dimension_semantics = [#tpu.dimension_semantics<parallel>, #tpu.dimension_semantics<parallel>], iteration_bounds = array<i64: 1, 1>, scalar_prefetch = 0 : i64, scratch_operands = 0 : i64, tpu.core_type = #tpu.core_type<tc>, window_params = [{transform_indices = @transform_0, window_bounds = array<i64: 128, 128>}, {transform_indices = @transform_1, window_bounds = array<i64: 128, 128>}, {transform_indices = @transform_2, window_bounds = array<i64: 1, 128>}, {transform_indices = @transform_3, window_bounds = array<i64: 128, 128>}, {transform_indices = @transform_4, window_bounds = array<i64: 128, 128>}]} {
    %c0 = arith.constant 0 : index
    %c0_0 = arith.constant 0 : index
    %0 = vector.load %arg2[%c0, %c0_0] : memref<128x128xf32, #tpu.memory_space<vmem>>, vector<128x128xf32>
    %c0_1 = arith.constant 0 : index
    %c0_2 = arith.constant 0 : index
    %1 = vector.load %arg3[%c0_1, %c0_2] : memref<128x128xf32, #tpu.memory_space<vmem>>, vector<128x128xf32>
    %cst = arith.constant dense<0.000000e+00> : vector<128x128xf32>
    %2 = tpu.matmul %0, %1, %cst {dimension_numbers = #tpu.dot_dimension_numbers<[1], [0], [0], [1], [0, 0, 1, 1], [], []>} : vector<128x128xf32>, vector<128x128xf32>, vector<128x128xf32> -> vector<128x128xf32>
    %c0_3 = arith.constant 0 : index
    %c0_4 = arith.constant 0 : index
    %3 = vector.load %arg4[%c0_3, %c0_4] : memref<1x128xf32, #tpu.memory_space<vmem>>, vector<1x128xf32>
    %4 = vector.broadcast %3 : vector<1x128xf32> to vector<128x128xf32>
    %5 = arith.addf %2, %4 : vector<128x128xf32>
    %c0_5 = arith.constant 0 : index
    %c0_6 = arith.constant 0 : index
    %6 = vector.load %arg5[%c0_5, %c0_6] : memref<128x128xf32, #tpu.memory_space<vmem>>, vector<128x128xf32>
    %7 = arith.addf %5, %6 : vector<128x128xf32>
    %cst_7 = arith.constant 0.000000e+00 : f32
    %8 = vector.broadcast %cst_7 : f32 to vector<128x128xf32>
    %9 = arith.maximumf %7, %8 : vector<128x128xf32>
    %c0_8 = arith.constant 0 : index
    %c0_9 = arith.constant 0 : index
    %10 = vector.load %arg6[%c0_8, %c0_9] : memref<128x128xf32, #tpu.memory_space<vmem>>, vector<128x128xf32>
    tpu.vector_store %arg6[%c0_8, %c0_9], %9 {strides = array<i32>} : memref<128x128xf32, #tpu.memory_space<vmem>>, vector<128x128xf32>,
    return
  }
  func.func @transform_0(%arg0: i32, %arg1: i32) -> (i32, i32) {
    %c0_i32 = arith.constant 0 : i32
    %c0_i32_0 = arith.constant 0 : i32
    return %arg0, %c0_i32 : i32, i32
  }
  func.func @transform_1(%arg0: i32, %arg1: i32) -> (i32, i32) {
    %c0_i32 = arith.constant 0 : i32
    %c0_i32_0 = arith.constant 0 : i32
    return %c0_i32, %arg1 : i32, i32
  }
  func.func @transform_2(%arg0: i32, %arg1: i32) -> (i32, i32) {
    %c0_i32 = arith.constant 0 : i32
    %c0_i32_0 = arith.constant 0 : i32
    return %c0_i32, %arg1 : i32, i32
  }
  func.func @transform_3(%arg0: i32, %arg1: i32) -> (i32, i32) {
    %c0_i32 = arith.constant 0 : i32
    return %arg0, %arg1 : i32, i32
  }
  func.func @transform_4(%arg0: i32, %arg1: i32) -> (i32, i32) {
    %c0_i32 = arith.constant 0 : i32
    return %arg0, %arg1 : i32, i32
  }
}

module attributes {stable_mosaic.version = 11 : i64} {
  func.func @_fused_matmul_kernel(%arg0: i32, %arg1: i32, %arg2: memref<128x128xf32, #tpu.memory_space<vmem>>, %arg3: memref<128x128xf32, #tpu.memory_space<vmem>>, %arg4: memref<1x128xf32, #tpu.memory_space<vmem>>, %arg5: memref<128x128xf32, #tpu.memory_space<vmem>>) attributes {dimension_semantics = [#tpu.dimension_semantics<parallel>, #tpu.dimension_semantics<parallel>], iteration_bounds = array<i64: 1, 1>, scalar_prefetch = 0 : i64, scratch_operands = 0 : i64, tpu.core_type = #tpu.core_type<tc>, window_params = [{transform_indices = @transform_0, window_bounds = array<i64: 128, 128>}, {transform_indices = @transform_1, window_bounds = array<i64: 128, 128>}, {transform_indices = @transform_2, window_bounds = array<i64: 1, 128>}, {transform_indices = @transform_3, window_bounds = array<i64: 128, 128>}]} {
    %c0 = arith.constant 0 : index
    %c0_0 = arith.constant 0 : index
    %0 = vector.load %arg2[%c0, %c0_0] : memref<128x128xf32, #tpu.memory_space<vmem>>, vector<128x128xf32>
    %c0_1 = arith.constant 0 : index
    %c0_2 = arith.constant 0 : index
    %1 = vector.load %arg3[%c0_1, %c0_2] : memref<128x128xf32, #tpu.memory_space<vmem>>, vector<128x128xf32>
    %cst = arith.constant dense<0.000000e+00> : vector<128x128xf32>
    %2 = tpu.matmul %0, %1, %cst {dimension_numbers = #tpu.dot_dimension_numbers<[1], [0], [0], [1], [0, 0, 1, 1], [], []>} : vector<128x128xf32>, vector<128x128xf32>, vector<128x128xf32> -> vector<128x128xf32>
    %c0_3 = arith.constant 0 : index
    %c0_4 = arith.constant 0 : index
    %3 = vector.load %arg4[%c0_3, %c0_4] : memref<1x128xf32, #tpu.memory_space<vmem>>, vector<1x128xf32>
    %4 = vector.broadcast %3 : vector<1x128xf32> to vector<128x128xf32>
    %5 = arith.addf %2, %4 : vector<128x128xf32>
    %cst_5 = arith.constant 0.000000e+00 : f32
    %6 = vector.broadcast %cst_5 : f32 to vector<128x128xf32>
    %7 = arith.maximumf %5, %6 : vector<128x128xf32>
    %c0_6 = arith.constant 0 : index
    %c0_7 = arith.constant 0 : index
    %8 = vector.load %arg5[%c0_6, %c0_7] : memref<128x128xf32, #tpu.memory_space<vmem>>, vector<128x128xf32>
    tpu.vector_store %arg5[%c0_6, %c0_7], %7 {strides = array<i32>} : memref<128x128xf32, #tpu.memory_space<vmem>>, vector<128x128xf32>,
    return
  }
  func.func @transform_0(%arg0: i32, %arg1: i32) -> (i32, i32) {
    %c0_i32 = arith.constant 0 : i32
    %c0_i32_0 = arith.constant 0 : i32
    return %arg0, %c0_i32 : i32, i32
  }
  func.func @transform_1(%arg0: i32, %arg1: i32) -> (i32, i32) {
    %c0_i32 = arith.constant 0 : i32
    %c0_i32_0 = arith.constant 0 : i32
    return %c0_i32, %arg1 : i32, i32
  }
  func.func @transform_2(%arg0: i32, %arg1: i32) -> (i32, i32) {
    %c0_i32 = arith.constant 0 : i32
    %c0_i32_0 = arith.constant 0 : i32
    return %c0_i32, %arg1 : i32, i32
  }
  func.func @transform_3(%arg0: i32, %arg1: i32) -> (i32, i32) {
    %c0_i32 = arith.constant 0 : i32
    return %arg0, %arg1 : i32, i32
  }
}

module attributes {stable_mosaic.version = 11 : i64} {
  func.func @_fused_matmul_kernel(%arg0: i32, %arg1: i32, %arg2: memref<32x128xf32, #tpu.memory_space<vmem>>, %arg3: memref<128x128xf32, #tpu.memory_space<vmem>>, %arg4: memref<1x128xf32, #tpu.memory_space<vmem>>, %arg5: memref<1x128xf32, #tpu.memory_space<vmem>>, %arg6: memref<32x128xf32, #tpu.memory_space<vmem>>) attributes {dimension_semantics = [#tpu.dimension_semantics<parallel>, #tpu.dimension_semantics<parallel>], iteration_bounds = array<i64: 1, 1>, scalar_prefetch = 0 : i64, scratch_operands = 0 : i64, tpu.core_type = #tpu.core_type<tc>, window_params = [{transform_indices = @transform_0, window_bounds = array<i64: 32, 128>}, {transform_indices = @transform_1, window_bounds = array<i64: 128, 128>}, {transform_indices = @transform_2, window_bounds = array<i64: 1, 128>}, {transform_indices = @transform_3, window_bounds = array<i64: 1, 128>}, {transform_indices = @transform_4, window_bounds = array<i64: 32, 128>}]} {
    %c0 = arith.constant 0 : index
    %c0_0 = arith.constant 0 : index
    %0 = vector.load %arg2[%c0, %c0_0] : memref<32x128xf32, #tpu.memory_space<vmem>>, vector<32x128xf32>
    %c0_1 = arith.constant 0 : index
    %c0_2 = arith.constant 0 : index
    %1 = vector.load %arg3[%c0_1, %c0_2] : memref<128x128xf32, #tpu.memory_space<vmem>>, vector<128x128xf32>
    %cst = arith.constant dense<0.000000e+00> : vector<32x128xf32>
    %2 = tpu.matmul %0, %1, %cst {dimension_numbers = #tpu.dot_dimension_numbers<[1], [0], [0], [1], [0, 0, 1, 1], [], []>} : vector<32x128xf32>, vector<128x128xf32>, vector<32x128xf32> -> vector<32x128xf32>
    %c0_3 = arith.constant 0 : index
    %c0_4 = arith.constant 0 : index
    %3 = vector.load %arg4[%c0_3, %c0_4] : memref<1x128xf32, #tpu.memory_space<vmem>>, vector<1x128xf32>
    %4 = vector.broadcast %3 : vector<1x128xf32> to vector<32x128xf32>
    %5 = arith.addf %2, %4 : vector<32x128xf32>
    %c0_5 = arith.constant 0 : index
    %c0_6 = arith.constant 0 : index
    %6 = vector.load %arg5[%c0_5, %c0_6] : memref<1x128xf32, #tpu.memory_space<vmem>>, vector<1x128xf32>
    %cst_7 = arith.constant 0.000000e+00 : f32
    %7 = vector.broadcast %cst_7 : f32 to vector<1x128xf32>
    %8 = arith.cmpf ogt, %6, %7 : vector<1x128xf32>
    %cst_8 = arith.constant 0.000000e+00 : f32
    %9 = vector.broadcast %cst_8 : f32 to vector<32x128xf32>
    %10 = arith.maximumf %5, %9 : vector<32x128xf32>
    %11 = vector.shape_cast %8 : vector<1x128xi1> to vector<1x128xi1>
    %12 = vector.broadcast %11 : vector<1x128xi1> to vector<32x128xi1>
    %13 = arith.select %12, %10, %5 : vector<32x128xi1>, vector<32x128xf32>
    %c0_9 = arith.constant 0 : index
    %c0_10 = arith.constant 0 : index
    %14 = vector.load %arg6[%c0_9, %c0_10] : memref<32x128xf32, #tpu.memory_space<vmem>>, vector<32x128xf32>
    tpu.vector_store %arg6[%c0_9, %c0_10], %13 {strides = array<i32>} : memref<32x128xf32, #tpu.memory_space<vmem>>, vector<32x128xf32>,
    return
  }
  func.func @transform_0(%arg0: i32, %arg1: i32) -> (i32, i32) {
    %c0_i32 = arith.constant 0 : i32
    %c0_i32_0 = arith.constant 0 : i32
    return %arg0, %c0_i32 : i32, i32
  }
  func.func @transform_1(%arg0: i32, %arg1: i32) -> (i32, i32) {
    %c0_i32 = arith.constant 0 : i32
    %c0_i32_0 = arith.constant 0 : i32
    return %c0_i32, %arg1 : i32, i32
  }
  func.func @transform_2(%arg0: i32, %arg1: i32) -> (i32, i32) {
    %c0_i32 = arith.constant 0 : i32
    %c0_i32_0 = arith.constant 0 : i32
    return %c0_i32, %arg1 : i32, i32
  }
  func.func @transform_3(%arg0: i32, %arg1: i32) -> (i32, i32) {
    %c0_i32 = arith.constant 0 : i32
    %c0_i32_0 = arith.constant 0 : i32
    return %c0_i32, %arg1 : i32, i32
  }
  func.func @transform_4(%arg0: i32, %arg1: i32) -> (i32, i32) {
    %c0_i32 = arith.constant 0 : i32
    return %arg0, %arg1 : i32, i32
  }
}

module attributes {stable_mosaic.version = 11 : i64} {
  func.func @_fused_matmul_kernel(%arg0: i32, %arg1: i32, %arg2: memref<32x256xf32, #tpu.memory_space<vmem>>, %arg3: memref<256x128xf32, #tpu.memory_space<vmem>>, %arg4: memref<1x128xf32, #tpu.memory_space<vmem>>, %arg5: memref<32x128xf32, #tpu.memory_space<vmem>>) attributes {dimension_semantics = [#tpu.dimension_semantics<parallel>, #tpu.dimension_semantics<parallel>], iteration_bounds = array<i64: 1, 1>, scalar_prefetch = 0 : i64, scratch_operands = 0 : i64, tpu.core_type = #tpu.core_type<tc>, window_params = [{transform_indices = @transform_0, window_bounds = array<i64: 32, 256>}, {transform_indices = @transform_1, window_bounds = array<i64: 256, 128>}, {transform_indices = @transform_2, window_bounds = array<i64: 1, 128>}, {transform_indices = @transform_3, window_bounds = array<i64: 32, 128>}]} {
    %c0 = arith.constant 0 : index
    %c0_0 = arith.constant 0 : index
    %0 = vector.load %arg2[%c0, %c0_0] : memref<32x256xf32, #tpu.memory_space<vmem>>, vector<32x256xf32>
    %c0_1 = arith.constant 0 : index
    %c0_2 = arith.constant 0 : index
    %1 = vector.load %arg3[%c0_1, %c0_2] : memref<256x128xf32, #tpu.memory_space<vmem>>, vector<256x128xf32>
    %cst = arith.constant dense<0.000000e+00> : vector<32x128xf32>
    %2 = tpu.matmul %0, %1, %cst {dimension_numbers = #tpu.dot_dimension_numbers<[1], [0], [0], [1], [0, 0, 1, 1], [], []>} : vector<32x256xf32>, vector<256x128xf32>, vector<32x128xf32> -> vector<32x128xf32>
    %c0_3 = arith.constant 0 : index
    %c0_4 = arith.constant 0 : index
    %3 = vector.load %arg4[%c0_3, %c0_4] : memref<1x128xf32, #tpu.memory_space<vmem>>, vector<1x128xf32>
    %4 = vector.broadcast %3 : vector<1x128xf32> to vector<32x128xf32>
    %5 = arith.addf %2, %4 : vector<32x128xf32>
    %cst_5 = arith.constant 0.000000e+00 : f32
    %6 = vector.broadcast %cst_5 : f32 to vector<32x128xf32>
    %7 = arith.maximumf %5, %6 : vector<32x128xf32>
    %c0_6 = arith.constant 0 : index
    %c0_7 = arith.constant 0 : index
    %8 = vector.load %arg5[%c0_6, %c0_7] : memref<32x128xf32, #tpu.memory_space<vmem>>, vector<32x128xf32>
    tpu.vector_store %arg5[%c0_6, %c0_7], %7 {strides = array<i32>} : memref<32x128xf32, #tpu.memory_space<vmem>>, vector<32x128xf32>,
    return
  }
  func.func @transform_0(%arg0: i32, %arg1: i32) -> (i32, i32) {
    %c0_i32 = arith.constant 0 : i32
    %c0_i32_0 = arith.constant 0 : i32
    return %arg0, %c0_i32 : i32, i32
  }
  func.func @transform_1(%arg0: i32, %arg1: i32) -> (i32, i32) {
    %c0_i32 = arith.constant 0 : i32
    %c0_i32_0 = arith.constant 0 : i32
    return %c0_i32, %arg1 : i32, i32
  }
  func.func @transform_2(%arg0: i32, %arg1: i32) -> (i32, i32) {
    %c0_i32 = arith.constant 0 : i32
    %c0_i32_0 = arith.constant 0 : i32
    return %c0_i32, %arg1 : i32, i32
  }
  func.func @transform_3(%arg0: i32, %arg1: i32) -> (i32, i32) {
    %c0_i32 = arith.constant 0 : i32
    return %arg0, %arg1 : i32, i32
  }
}

module attributes {stable_mosaic.version = 11 : i64} {
  func.func @_fused_matmul_kernel(%arg0: i32, %arg1: i32, %arg2: memref<32x256xf32, #tpu.memory_space<vmem>>, %arg3: memref<256x128xf32, #tpu.memory_space<vmem>>, %arg4: memref<1x128xf32, #tpu.memory_space<vmem>>, %arg5: memref<32x128xf32, #tpu.memory_space<vmem>>, %arg6: memref<32x128xf32, #tpu.memory_space<vmem>>) attributes {dimension_semantics = [#tpu.dimension_semantics<parallel>, #tpu.dimension_semantics<parallel>], iteration_bounds = array<i64: 1, 1>, scalar_prefetch = 0 : i64, scratch_operands = 0 : i64, tpu.core_type = #tpu.core_type<tc>, window_params = [{transform_indices = @transform_0, window_bounds = array<i64: 32, 256>}, {transform_indices = @transform_1, window_bounds = array<i64: 256, 128>}, {transform_indices = @transform_2, window_bounds = array<i64: 1, 128>}, {transform_indices = @transform_3, window_bounds = array<i64: 32, 128>}, {transform_indices = @transform_4, window_bounds = array<i64: 32, 128>}]} {
    %c0 = arith.constant 0 : index
    %c0_0 = arith.constant 0 : index
    %0 = vector.load %arg2[%c0, %c0_0] : memref<32x256xf32, #tpu.memory_space<vmem>>, vector<32x256xf32>
    %c0_1 = arith.constant 0 : index
    %c0_2 = arith.constant 0 : index
    %1 = vector.load %arg3[%c0_1, %c0_2] : memref<256x128xf32, #tpu.memory_space<vmem>>, vector<256x128xf32>
    %cst = arith.constant dense<0.000000e+00> : vector<32x128xf32>
    %2 = tpu.matmul %0, %1, %cst {dimension_numbers = #tpu.dot_dimension_numbers<[1], [0], [0], [1], [0, 0, 1, 1], [], []>} : vector<32x256xf32>, vector<256x128xf32>, vector<32x128xf32> -> vector<32x128xf32>
    %c0_3 = arith.constant 0 : index
    %c0_4 = arith.constant 0 : index
    %3 = vector.load %arg4[%c0_3, %c0_4] : memref<1x128xf32, #tpu.memory_space<vmem>>, vector<1x128xf32>
    %4 = vector.broadcast %3 : vector<1x128xf32> to vector<32x128xf32>
    %5 = arith.addf %2, %4 : vector<32x128xf32>
    %c0_5 = arith.constant 0 : index
    %c0_6 = arith.constant 0 : index
    %6 = vector.load %arg5[%c0_5, %c0_6] : memref<32x128xf32, #tpu.memory_space<vmem>>, vector<32x128xf32>
    %7 = arith.addf %5, %6 : vector<32x128xf32>
    %cst_7 = arith.constant 0.000000e+00 : f32
    %8 = vector.broadcast %cst_7 : f32 to vector<32x128xf32>
    %9 = arith.maximumf %7, %8 : vector<32x128xf32>
    %c0_8 = arith.constant 0 : index
    %c0_9 = arith.constant 0 : index
    %10 = vector.load %arg6[%c0_8, %c0_9] : memref<32x128xf32, #tpu.memory_space<vmem>>, vector<32x128xf32>
    tpu.vector_store %arg6[%c0_8, %c0_9], %9 {strides = array<i32>} : memref<32x128xf32, #tpu.memory_space<vmem>>, vector<32x128xf32>,
    return
  }
  func.func @transform_0(%arg0: i32, %arg1: i32) -> (i32, i32) {
    %c0_i32 = arith.constant 0 : i32
    %c0_i32_0 = arith.constant 0 : i32
    return %arg0, %c0_i32 : i32, i32
  }
  func.func @transform_1(%arg0: i32, %arg1: i32) -> (i32, i32) {
    %c0_i32 = arith.constant 0 : i32
    %c0_i32_0 = arith.constant 0 : i32
    return %c0_i32, %arg1 : i32, i32
  }
  func.func @transform_2(%arg0: i32, %arg1: i32) -> (i32, i32) {
    %c0_i32 = arith.constant 0 : i32
    %c0_i32_0 = arith.constant 0 : i32
    return %c0_i32, %arg1 : i32, i32
  }
  func.func @transform_3(%arg0: i32, %arg1: i32) -> (i32, i32) {
    %c0_i32 = arith.constant 0 : i32
    return %arg0, %arg1 : i32, i32
  }
  func.func @transform_4(%arg0: i32, %arg1: i32) -> (i32, i32) {
    %c0_i32 = arith.constant 0 : i32
    return %arg0, %arg1 : i32, i32
  }
}

module attributes {stable_mosaic.version = 11 : i64} {
  func.func @_fused_matmul_kernel(%arg0: i32, %arg1: i32, %arg2: memref<8x256xf32, #tpu.memory_space<vmem>>, %arg3: memref<256x128xf32, #tpu.memory_space<vmem>>, %arg4: memref<1x128xf32, #tpu.memory_space<vmem>>, %arg5: memref<1x128xf32, #tpu.memory_space<vmem>>, %arg6: memref<8x128xf32, #tpu.memory_space<vmem>>) attributes {dimension_semantics = [#tpu.dimension_semantics<parallel>, #tpu.dimension_semantics<parallel>], iteration_bounds = array<i64: 1, 1>, scalar_prefetch = 0 : i64, scratch_operands = 0 : i64, tpu.core_type = #tpu.core_type<tc>, window_params = [{transform_indices = @transform_0, window_bounds = array<i64: 8, 256>}, {transform_indices = @transform_1, window_bounds = array<i64: 256, 128>}, {transform_indices = @transform_2, window_bounds = array<i64: 1, 128>}, {transform_indices = @transform_3, window_bounds = array<i64: 1, 128>}, {transform_indices = @transform_4, window_bounds = array<i64: 8, 128>}]} {
    %c0 = arith.constant 0 : index
    %c0_0 = arith.constant 0 : index
    %0 = vector.load %arg2[%c0, %c0_0] : memref<8x256xf32, #tpu.memory_space<vmem>>, vector<8x256xf32>
    %c0_1 = arith.constant 0 : index
    %c0_2 = arith.constant 0 : index
    %1 = vector.load %arg3[%c0_1, %c0_2] : memref<256x128xf32, #tpu.memory_space<vmem>>, vector<256x128xf32>
    %cst = arith.constant dense<0.000000e+00> : vector<8x128xf32>
    %2 = tpu.matmul %0, %1, %cst {dimension_numbers = #tpu.dot_dimension_numbers<[1], [0], [0], [1], [0, 0, 1, 1], [], []>} : vector<8x256xf32>, vector<256x128xf32>, vector<8x128xf32> -> vector<8x128xf32>
    %c0_3 = arith.constant 0 : index
    %c0_4 = arith.constant 0 : index
    %3 = vector.load %arg4[%c0_3, %c0_4] : memref<1x128xf32, #tpu.memory_space<vmem>>, vector<1x128xf32>
    %4 = vector.broadcast %3 : vector<1x128xf32> to vector<8x128xf32>
    %5 = arith.addf %2, %4 : vector<8x128xf32>
    %c0_5 = arith.constant 0 : index
    %c0_6 = arith.constant 0 : index
    %6 = vector.load %arg5[%c0_5, %c0_6] : memref<1x128xf32, #tpu.memory_space<vmem>>, vector<1x128xf32>
    %cst_7 = arith.constant 0.000000e+00 : f32
    %7 = vector.broadcast %cst_7 : f32 to vector<1x128xf32>
    %8 = arith.cmpf ogt, %6, %7 : vector<1x128xf32>
    %cst_8 = arith.constant 0.000000e+00 : f32
    %9 = vector.broadcast %cst_8 : f32 to vector<8x128xf32>
    %10 = arith.maximumf %5, %9 : vector<8x128xf32>
    %11 = vector.shape_cast %8 : vector<1x128xi1> to vector<1x128xi1>
    %12 = vector.broadcast %11 : vector<1x128xi1> to vector<8x128xi1>
    %13 = arith.select %12, %10, %5 : vector<8x128xi1>, vector<8x128xf32>
    %c0_9 = arith.constant 0 : index
    %c0_10 = arith.constant 0 : index
    %14 = vector.load %arg6[%c0_9, %c0_10] : memref<8x128xf32, #tpu.memory_space<vmem>>, vector<8x128xf32>
    tpu.vector_store %arg6[%c0_9, %c0_10], %13 {strides = array<i32>} : memref<8x128xf32, #tpu.memory_space<vmem>>, vector<8x128xf32>,
    return
  }
  func.func @transform_0(%arg0: i32, %arg1: i32) -> (i32, i32) {
    %c0_i32 = arith.constant 0 : i32
    %c0_i32_0 = arith.constant 0 : i32
    return %arg0, %c0_i32 : i32, i32
  }
  func.func @transform_1(%arg0: i32, %arg1: i32) -> (i32, i32) {
    %c0_i32 = arith.constant 0 : i32
    %c0_i32_0 = arith.constant 0 : i32
    return %c0_i32, %arg1 : i32, i32
  }
  func.func @transform_2(%arg0: i32, %arg1: i32) -> (i32, i32) {
    %c0_i32 = arith.constant 0 : i32
    %c0_i32_0 = arith.constant 0 : i32
    return %c0_i32, %arg1 : i32, i32
  }
  func.func @transform_3(%arg0: i32, %arg1: i32) -> (i32, i32) {
    %c0_i32 = arith.constant 0 : i32
    %c0_i32_0 = arith.constant 0 : i32
    return %c0_i32, %arg1 : i32, i32
  }
  func.func @transform_4(%arg0: i32, %arg1: i32) -> (i32, i32) {
    %c0_i32 = arith.constant 0 : i32
    return %arg0, %arg1 : i32, i32
  }
}

module attributes {stable_mosaic.version = 11 : i64} {
  func.func @_fused_matmul_kernel(%arg0: i32, %arg1: i32, %arg2: memref<8x384xf32, #tpu.memory_space<vmem>>, %arg3: memref<384x128xf32, #tpu.memory_space<vmem>>, %arg4: memref<1x128xf32, #tpu.memory_space<vmem>>, %arg5: memref<8x128xf32, #tpu.memory_space<vmem>>) attributes {dimension_semantics = [#tpu.dimension_semantics<parallel>, #tpu.dimension_semantics<parallel>], iteration_bounds = array<i64: 1, 1>, scalar_prefetch = 0 : i64, scratch_operands = 0 : i64, tpu.core_type = #tpu.core_type<tc>, window_params = [{transform_indices = @transform_0, window_bounds = array<i64: 8, 384>}, {transform_indices = @transform_1, window_bounds = array<i64: 384, 128>}, {transform_indices = @transform_2, window_bounds = array<i64: 1, 128>}, {transform_indices = @transform_3, window_bounds = array<i64: 8, 128>}]} {
    %c0 = arith.constant 0 : index
    %c0_0 = arith.constant 0 : index
    %0 = vector.load %arg2[%c0, %c0_0] : memref<8x384xf32, #tpu.memory_space<vmem>>, vector<8x384xf32>
    %c0_1 = arith.constant 0 : index
    %c0_2 = arith.constant 0 : index
    %1 = vector.load %arg3[%c0_1, %c0_2] : memref<384x128xf32, #tpu.memory_space<vmem>>, vector<384x128xf32>
    %cst = arith.constant dense<0.000000e+00> : vector<8x128xf32>
    %2 = tpu.matmul %0, %1, %cst {dimension_numbers = #tpu.dot_dimension_numbers<[1], [0], [0], [1], [0, 0, 1, 1], [], []>} : vector<8x384xf32>, vector<384x128xf32>, vector<8x128xf32> -> vector<8x128xf32>
    %c0_3 = arith.constant 0 : index
    %c0_4 = arith.constant 0 : index
    %3 = vector.load %arg4[%c0_3, %c0_4] : memref<1x128xf32, #tpu.memory_space<vmem>>, vector<1x128xf32>
    %4 = vector.broadcast %3 : vector<1x128xf32> to vector<8x128xf32>
    %5 = arith.addf %2, %4 : vector<8x128xf32>
    %cst_5 = arith.constant 0.000000e+00 : f32
    %6 = vector.broadcast %cst_5 : f32 to vector<8x128xf32>
    %7 = arith.maximumf %5, %6 : vector<8x128xf32>
    %c0_6 = arith.constant 0 : index
    %c0_7 = arith.constant 0 : index
    %8 = vector.load %arg5[%c0_6, %c0_7] : memref<8x128xf32, #tpu.memory_space<vmem>>, vector<8x128xf32>
    tpu.vector_store %arg5[%c0_6, %c0_7], %7 {strides = array<i32>} : memref<8x128xf32, #tpu.memory_space<vmem>>, vector<8x128xf32>,
    return
  }
  func.func @transform_0(%arg0: i32, %arg1: i32) -> (i32, i32) {
    %c0_i32 = arith.constant 0 : i32
    %c0_i32_0 = arith.constant 0 : i32
    return %arg0, %c0_i32 : i32, i32
  }
  func.func @transform_1(%arg0: i32, %arg1: i32) -> (i32, i32) {
    %c0_i32 = arith.constant 0 : i32
    %c0_i32_0 = arith.constant 0 : i32
    return %c0_i32, %arg1 : i32, i32
  }
  func.func @transform_2(%arg0: i32, %arg1: i32) -> (i32, i32) {
    %c0_i32 = arith.constant 0 : i32
    %c0_i32_0 = arith.constant 0 : i32
    return %c0_i32, %arg1 : i32, i32
  }
  func.func @transform_3(%arg0: i32, %arg1: i32) -> (i32, i32) {
    %c0_i32 = arith.constant 0 : i32
    return %arg0, %arg1 : i32, i32
  }
}

module attributes {stable_mosaic.version = 11 : i64} {
  func.func @_fused_matmul_kernel(%arg0: i32, %arg1: i32, %arg2: memref<8x384xf32, #tpu.memory_space<vmem>>, %arg3: memref<384x128xf32, #tpu.memory_space<vmem>>, %arg4: memref<1x128xf32, #tpu.memory_space<vmem>>, %arg5: memref<8x128xf32, #tpu.memory_space<vmem>>, %arg6: memref<8x128xf32, #tpu.memory_space<vmem>>) attributes {dimension_semantics = [#tpu.dimension_semantics<parallel>, #tpu.dimension_semantics<parallel>], iteration_bounds = array<i64: 1, 1>, scalar_prefetch = 0 : i64, scratch_operands = 0 : i64, tpu.core_type = #tpu.core_type<tc>, window_params = [{transform_indices = @transform_0, window_bounds = array<i64: 8, 384>}, {transform_indices = @transform_1, window_bounds = array<i64: 384, 128>}, {transform_indices = @transform_2, window_bounds = array<i64: 1, 128>}, {transform_indices = @transform_3, window_bounds = array<i64: 8, 128>}, {transform_indices = @transform_4, window_bounds = array<i64: 8, 128>}]} {
    %c0 = arith.constant 0 : index
    %c0_0 = arith.constant 0 : index
    %0 = vector.load %arg2[%c0, %c0_0] : memref<8x384xf32, #tpu.memory_space<vmem>>, vector<8x384xf32>
    %c0_1 = arith.constant 0 : index
    %c0_2 = arith.constant 0 : index
    %1 = vector.load %arg3[%c0_1, %c0_2] : memref<384x128xf32, #tpu.memory_space<vmem>>, vector<384x128xf32>
    %cst = arith.constant dense<0.000000e+00> : vector<8x128xf32>
    %2 = tpu.matmul %0, %1, %cst {dimension_numbers = #tpu.dot_dimension_numbers<[1], [0], [0], [1], [0, 0, 1, 1], [], []>} : vector<8x384xf32>, vector<384x128xf32>, vector<8x128xf32> -> vector<8x128xf32>
    %c0_3 = arith.constant 0 : index
    %c0_4 = arith.constant 0 : index
    %3 = vector.load %arg4[%c0_3, %c0_4] : memref<1x128xf32, #tpu.memory_space<vmem>>, vector<1x128xf32>
    %4 = vector.broadcast %3 : vector<1x128xf32> to vector<8x128xf32>
    %5 = arith.addf %2, %4 : vector<8x128xf32>
    %c0_5 = arith.constant 0 : index
    %c0_6 = arith.constant 0 : index
    %6 = vector.load %arg5[%c0_5, %c0_6] : memref<8x128xf32, #tpu.memory_space<vmem>>, vector<8x128xf32>
    %7 = arith.addf %5, %6 : vector<8x128xf32>
    %cst_7 = arith.constant 0.000000e+00 : f32
    %8 = vector.broadcast %cst_7 : f32 to vector<8x128xf32>
    %9 = arith.maximumf %7, %8 : vector<8x128xf32>
    %c0_8 = arith.constant 0 : index
    %c0_9 = arith.constant 0 : index
    %10 = vector.load %arg6[%c0_8, %c0_9] : memref<8x128xf32, #tpu.memory_space<vmem>>, vector<8x128xf32>
    tpu.vector_store %arg6[%c0_8, %c0_9], %9 {strides = array<i32>} : memref<8x128xf32, #tpu.memory_space<vmem>>, vector<8x128xf32>,
    return
  }
  func.func @transform_0(%arg0: i32, %arg1: i32) -> (i32, i32) {
    %c0_i32 = arith.constant 0 : i32
    %c0_i32_0 = arith.constant 0 : i32
    return %arg0, %c0_i32 : i32, i32
  }
  func.func @transform_1(%arg0: i32, %arg1: i32) -> (i32, i32) {
    %c0_i32 = arith.constant 0 : i32
    %c0_i32_0 = arith.constant 0 : i32
    return %c0_i32, %arg1 : i32, i32
  }
  func.func @transform_2(%arg0: i32, %arg1: i32) -> (i32, i32) {
    %c0_i32 = arith.constant 0 : i32
    %c0_i32_0 = arith.constant 0 : i32
    return %c0_i32, %arg1 : i32, i32
  }
  func.func @transform_3(%arg0: i32, %arg1: i32) -> (i32, i32) {
    %c0_i32 = arith.constant 0 : i32
    return %arg0, %arg1 : i32, i32
  }
  func.func @transform_4(%arg0: i32, %arg1: i32) -> (i32, i32) {
    %c0_i32 = arith.constant 0 : i32
    return %arg0, %arg1 : i32, i32
  }
}

module attributes {stable_mosaic.version = 11 : i64} {
  func.func @_fused_matmul_kernel(%arg0: i32, %arg1: i32, %arg2: memref<8x384xf32, #tpu.memory_space<vmem>>, %arg3: memref<384x128xf32, #tpu.memory_space<vmem>>, %arg4: memref<1x128xf32, #tpu.memory_space<vmem>>, %arg5: memref<8x128xf32, #tpu.memory_space<vmem>>, %arg6: memref<8x128xf32, #tpu.memory_space<vmem>>) attributes {dimension_semantics = [#tpu.dimension_semantics<parallel>, #tpu.dimension_semantics<parallel>], iteration_bounds = array<i64: 1, 1>, scalar_prefetch = 0 : i64, scratch_operands = 0 : i64, tpu.core_type = #tpu.core_type<tc>, window_params = [{transform_indices = @transform_0, window_bounds = array<i64: 8, 384>}, {transform_indices = @transform_1, window_bounds = array<i64: 384, 128>}, {transform_indices = @transform_2, window_bounds = array<i64: 1, 128>}, {transform_indices = @transform_3, window_bounds = array<i64: 8, 128>}, {transform_indices = @transform_4, window_bounds = array<i64: 8, 128>}]} {
    %c0 = arith.constant 0 : index
    %c0_0 = arith.constant 0 : index
    %0 = vector.load %arg2[%c0, %c0_0] : memref<8x384xf32, #tpu.memory_space<vmem>>, vector<8x384xf32>
    %c0_1 = arith.constant 0 : index
    %c0_2 = arith.constant 0 : index
    %1 = vector.load %arg3[%c0_1, %c0_2] : memref<384x128xf32, #tpu.memory_space<vmem>>, vector<384x128xf32>
    %cst = arith.constant dense<0.000000e+00> : vector<8x128xf32>
    %2 = tpu.matmul %0, %1, %cst {dimension_numbers = #tpu.dot_dimension_numbers<[1], [0], [0], [1], [0, 0, 1, 1], [], []>} : vector<8x384xf32>, vector<384x128xf32>, vector<8x128xf32> -> vector<8x128xf32>
    %c0_3 = arith.constant 0 : index
    %c0_4 = arith.constant 0 : index
    %3 = vector.load %arg4[%c0_3, %c0_4] : memref<1x128xf32, #tpu.memory_space<vmem>>, vector<1x128xf32>
    %4 = vector.broadcast %3 : vector<1x128xf32> to vector<8x128xf32>
    %5 = arith.addf %2, %4 : vector<8x128xf32>
    %c0_5 = arith.constant 0 : index
    %c0_6 = arith.constant 0 : index
    %6 = vector.load %arg5[%c0_5, %c0_6] : memref<8x128xf32, #tpu.memory_space<vmem>>, vector<8x128xf32>
    %7 = arith.addf %5, %6 : vector<8x128xf32>
    %cst_7 = arith.constant 0.000000e+00 : f32
    %8 = vector.broadcast %cst_7 : f32 to vector<8x128xf32>
    %9 = arith.maximumf %7, %8 : vector<8x128xf32>
    %c0_8 = arith.constant 0 : index
    %c0_9 = arith.constant 0 : index
    %10 = vector.load %arg6[%c0_8, %c0_9] : memref<8x128xf32, #tpu.memory_space<vmem>>, vector<8x128xf32>
    tpu.vector_store %arg6[%c0_8, %c0_9], %9 {strides = array<i32>} : memref<8x128xf32, #tpu.memory_space<vmem>>, vector<8x128xf32>,
    return
  }
  func.func @transform_0(%arg0: i32, %arg1: i32) -> (i32, i32) {
    %c0_i32 = arith.constant 0 : i32
    %c0_i32_0 = arith.constant 0 : i32
    return %arg0, %c0_i32 : i32, i32
  }
  func.func @transform_1(%arg0: i32, %arg1: i32) -> (i32, i32) {
    %c0_i32 = arith.constant 0 : i32
    %c0_i32_0 = arith.constant 0 : i32
    return %c0_i32, %arg1 : i32, i32
  }
  func.func @transform_2(%arg0: i32, %arg1: i32) -> (i32, i32) {
    %c0_i32 = arith.constant 0 : i32
    %c0_i32_0 = arith.constant 0 : i32
    return %c0_i32, %arg1 : i32, i32
  }
  func.func @transform_3(%arg0: i32, %arg1: i32) -> (i32, i32) {
    %c0_i32 = arith.constant 0 : i32
    return %arg0, %arg1 : i32, i32
  }
  func.func @transform_4(%arg0: i32, %arg1: i32) -> (i32, i32) {
    %c0_i32 = arith.constant 0 : i32
    return %arg0, %arg1 : i32, i32
  }
}

</mosaic_0001>

<bundles_post_ra>
// kernel: _lambda_.12
= control target key start
LH: loop header
LB: loop body
LE: loop exit
PB: predicated region body
PF: predicated region fallthrough
CT: control target
= control target key end

     0   :  { %v220_v40 = vlaneseq  ;;  %v399_v44 = vmov 0   ;;  %s628_s1 = inlined_call_operand.vmem [shape: f32[128,128], index: 1, kind: input, shape index: {}]   ;;  %s629_s0 = inlined_call_operand.vmem [shape: f32[128,128], index: 0, kind: input, shape index: {}]   ;;  %s630_s3 = inlined_call_operand.vmem [shape: f32[1,128], index: 3, kind: input, shape index: {}]   ;;  %s631_s2 = inlined_call_operand.vmem [shape: f32[1,128], index: 2, kind: input, shape index: {}]   ;;  %s632_s4 = inlined_call_operand.vmem [shape: f32[128,128], index: 4, kind: output, shape index: {}]  }
   0x1   :  { %v33_v0 = vld [vmem:[%s628_s1] sm:$0xff]  ;;  %v34_v1 = vld [vmem:[%s628_s1 + $0x8] sm:$0xff]  ;;  %v35_v2 = vld [vmem:[%s628_s1 + $0x10] sm:$0xff] }
   0x2   :  { %v350_v3 = vpack.c.bf16 %v34_v1, %v33_v0  ;;  %v36_v4 = vld [vmem:[%s628_s1 + $0x18] sm:$0xff]  ;;  %v37_v6 = vld [vmem:[%s628_s1 + $0x20] sm:$0xff]  ;;  %v38_v7 = vld [vmem:[%s628_s1 + $0x28] sm:$0xff]  ;;  %v221_v42 = vshrl.u32 %v220_v40, 7 }
   0x3   :  { %v354_v5 = vpack.c.bf16 %v36_v4, %v35_v2  ;;  %v358_v8 = vpack.c.bf16 %v38_v7, %v37_v6  ;;  %v17_v9 = vld [vmem:[%s629_s0] sm:$0xff]  ;;  %v39_v11 = vld [vmem:[%s628_s1 + $0x30] sm:$0xff]  ;;  %v40_v12 = vld [vmem:[%s628_s1 + $0x38] sm:$0xff] }
   0x4   :  { %351 = vmatprep.subr.bf16.mxu0 %v350_v3  ;;  %382 = vmatprep.subr.bf16.mxu1 %v350_v3  ;;  %v25_v10 = vld [vmem:[%s629_s0 + $0x40] sm:$0xff]  ;;  %v362_v13 = vpack.c.bf16 %v40_v12, %v39_v11  ;;  %v42_v15 = vld [vmem:[%s628_s1 + $0x48] sm:$0xff]  ;;  %v43_v17 = vld [vmem:[%s628_s1 + $0x50] sm:$0xff]  ;;  %v222_v43 = vsub.s32 0, %v221_v42 }
   0x5   :  { %353 = vmatpush3.bf16.msra.mxu0 %v350_v3  ;;  %390 = vmatpush3.bf16.msra.mxu1 %v350_v3  ;;  %v41_v14 = vld [vmem:[%s628_s1 + $0x40] sm:$0xff]  ;;  %v44_v18 = vld [vmem:[%s628_s1 + $0x58] sm:$0xff]  ;;  %v46_v21 = vld [vmem:[%s628_s1 + $0x68] sm:$0xff] }
   0x6   :  { %355 = vmatprep.subr.bf16.mxu0 %v354_v5  ;;  %383 = vmatprep.subr.bf16.mxu1 %v354_v5  ;;  %v366_v16 = vpack.c.bf16 %v42_v15, %v41_v14  ;;  %v370_v19 = vpack.c.bf16 %v44_v18, %v43_v17  ;;  %v45_v20 = vld [vmem:[%s628_s1 + $0x60] sm:$0xff]  ;;  %v47_v23 = vld [vmem:[%s628_s1 + $0x70] sm:$0xff]  ;;  %v48_v24 = vld [vmem:[%s628_s1 + $0x78] sm:$0xff] }
   0x7   :  { %326 = vmatprep.mubr.f32.mxu0 %v17_v9  ;;  %338 = vmatprep.mubr.f32.mxu1 %v25_v10  ;;  %v374_v22 = vpack.c.bf16 %v46_v21, %v45_v20  ;;  %v378_v25 = vpack.c.bf16 %v48_v24, %v47_v23  ;;  %v18_v26 = vld [vmem:[%s629_s0 + $0x8] sm:$0xff]  ;;  %v19_v28 = vld [vmem:[%s629_s0 + $0x10] sm:$0xff]  ;;  %v20_v30 = vld [vmem:[%s629_s0 + $0x18] sm:$0xff] }
   0x8   :  { %v26_v27 = vld [vmem:[%s629_s0 + $0x48] sm:$0xff]  ;;  %v27_v29 = vld [vmem:[%s629_s0 + $0x50] sm:$0xff]  ;;  %v28_v31 = vld [vmem:[%s629_s0 + $0x58] sm:$0xff] }
   0x9   :  { %357 = vmatpush3.bf16.msra.mxu0 %v354_v5  ;;  %391 = vmatpush3.bf16.msra.mxu1 %v354_v5  ;;  %v21_v32 = vld [vmem:[%s629_s0 + $0x20] sm:$0xff]  ;;  %v22_v34 = vld [vmem:[%s629_s0 + $0x28] sm:$0xff]  ;;  %v23_v36 = vld [vmem:[%s629_s0 + $0x30] sm:$0xff] }
   0xa   :  { %359 = vmatprep.subr.bf16.mxu0 %v358_v8  ;;  %384 = vmatprep.subr.bf16.mxu1 %v358_v8  ;;  %v29_v33 = vld [vmem:[%s629_s0 + $0x60] sm:$0xff]  ;;  %v30_v35 = vld [vmem:[%s629_s0 + $0x68] sm:$0xff]  ;;  %v31_v37 = vld [vmem:[%s629_s0 + $0x70] sm:$0xff] }
   0xb   :  { %v24_v38 = vld [vmem:[%s629_s0 + $0x38] sm:$0xff]  ;;  %v201_v41 = vld [vmem:[%s630_s3] sm:$0x1] }
   0xc   :  { %v32_v39 = vld [vmem:[%s629_s0 + $0x78] sm:$0xff]  ;;  %vm202_vm0 = vcmp.gt.f32.partialorder %v201_v41, 0.0  ;;  %v527_v46 = vld [vmem:[%s631_s2] ss:$0 sm:$0xff] }
   0xd   :  { %361 = vmatpush3.bf16.msra.mxu0 %v358_v8  ;;  %392 = vmatpush3.bf16.msra.mxu1 %v358_v8  ;;  %v219_v45 = vsel %vm202_vm0, 1, %v399_v44 }
   0xe   :  { %363 = vmatprep.subr.bf16.mxu0 %v362_v13  ;;  %385 = vmatprep.subr.bf16.mxu1 %v362_v13  ;;  %v529_v47 = vrot.slane %v219_v45, %v222_v43 }
  0x10   :  { %vm224_vm1 = vcmp.eq.s32.totalorder %v529_v47, 1 }
  0x11   :  { %365 = vmatpush3.bf16.msra.mxu0 %v362_v13  ;;  %393 = vmatpush3.bf16.msra.mxu1 %v362_v13 }
  0x12   :  { %367 = vmatprep.subr.bf16.mxu0 %v366_v16  ;;  %386 = vmatprep.subr.bf16.mxu1 %v366_v16 }
  0x15   :  { %369 = vmatpush3.bf16.msra.mxu0 %v366_v16  ;;  %394 = vmatpush3.bf16.msra.mxu1 %v366_v16 }
  0x16   :  { %371 = vmatprep.subr.bf16.mxu0 %v370_v19  ;;  %387 = vmatprep.subr.bf16.mxu1 %v370_v19 }
  0x19   :  { %373 = vmatpush3.bf16.msra.mxu0 %v370_v19  ;;  %395 = vmatpush3.bf16.msra.mxu1 %v370_v19 }
  0x1a   :  { %375 = vmatprep.subr.bf16.mxu0 %v374_v22  ;;  %388 = vmatprep.subr.bf16.mxu1 %v374_v22 }
  0x1d   :  { %377 = vmatpush3.bf16.msra.mxu0 %v374_v22  ;;  %396 = vmatpush3.bf16.msra.mxu1 %v374_v22 }
  0x1e   :  { %379 = vmatprep.subr.bf16.mxu0 %v378_v25  ;;  %389 = vmatprep.subr.bf16.mxu1 %v378_v25 }
  0x21   :  { %381 = vmatpush3.bf16.msra.mxu0 %v378_v25  ;;  %397 = vmatpush3.bf16.msra.mxu1 %v378_v25 }
  0x24   :  { %327 = vmatmul.mubr.f32.vlgmr.msra.gmra.mrb[0].mxu0 %v18_v26  ;;  %339 = vmatmul.mubr.f32.vlgmr.msra.gmra.mrb[0].mxu1 %v26_v27 }
  0x25   :  { %329 = vmatprep.mubr.f32.mxu0 %v19_v28  ;;  %341 = vmatprep.mubr.f32.mxu1 %v27_v29 }
  0x28   :  { %330 = vmatmul.mubr.f32.gmra.mrb[2].mxu0 %v20_v30  ;;  %342 = vmatmul.mubr.f32.gmra.mrb[2].mxu1 %v28_v31 }
  0x29   :  { %332 = vmatprep.mubr.f32.mxu0 %v21_v32  ;;  %344 = vmatprep.mubr.f32.mxu1 %v29_v33 }
  0x2c   :  { %333 = vmatmul.mubr.f32.gmra.mrb[4].mxu0 %v22_v34  ;;  %345 = vmatmul.mubr.f32.gmra.mrb[4].mxu1 %v30_v35 }
  0x2d   :  { %335 = vmatprep.mubr.f32.mxu0 %v23_v36  ;;  %347 = vmatprep.mubr.f32.mxu1 %v31_v37 }
  0x30   :  { %336 = vmatmul.mubr.f32.gmra.mrb[6].mxu0 %v24_v38  ;;  %348 = vmatmul.mubr.f32.gmra.mrb[6].mxu1 %v32_v39 }
  0xf7   :  { %v328_v48 = vpop.f32.mrb[0].mxu0  ;;  %v340_v49 = vpop.f32.mrb[0].mxu1 }
  0xf8   :  { %v128_v50 = vadd.f32 %v328_v48, %v527_v46  ;;  %v168_v51 = vadd.f32 %v340_v49, %v527_v46  ;;  %v122_v52 = vpop.f32.mrb[1].mxu0  ;;  %v162_v53 = vpop.f32.mrb[1].mxu1 }
  0xf9   :  { %v123_v54 = vadd.f32 %v527_v46, %v122_v52  ;;  %v163_v55 = vadd.f32 %v527_v46, %v162_v53 }
  0xfa   :  { %v204_v56 = vmax.f32 %v128_v50, 0.0  ;;  %v212_v57 = vmax.f32 %v168_v51, 0.0 }
  0xfb   :  { %v203_v58 = vmax.f32 %v123_v54, 0.0  ;;  %v211_v59 = vmax.f32 %v163_v55, 0.0  ;;  %v331_v60 = vpop.f32.mrb[2].mxu0  ;;  %v343_v61 = vpop.f32.mrb[2].mxu1 }
  0xfc   :  { %v226_v62 = vsel %vm224_vm1, %v204_v56, %v128_v50  ;;  %v234_v63 = vsel %vm224_vm1, %v212_v57, %v168_v51  ;;  %v138_v0 = vadd.f32 %v331_v60, %v527_v46  ;;  %v178_v1 = vadd.f32 %v343_v61, %v527_v46  ;;  %v132_v2 = vpop.f32.mrb[3].mxu0  ;;  %v172_v3 = vpop.f32.mrb[3].mxu1 }
  0xfd   :  { %242 = vst [vmem:[%s632_s4 + $0x8] sm:$0xff] %v226_v62  ;;  %250 = vst [vmem:[%s632_s4 + $0x48] sm:$0xff] %v234_v63  ;;  %v225_v4 = vsel %vm224_vm1, %v203_v58, %v123_v54  ;;  %v233_v5 = vsel %vm224_vm1, %v211_v59, %v163_v55  ;;  %v133_v6 = vadd.f32 %v527_v46, %v132_v2 }
  0xfe   :  { %v173_v7 = vadd.f32 %v527_v46, %v172_v3  ;;  %241 = vst [vmem:[%s632_s4] sm:$0xff] %v225_v4  ;;  %249 = vst [vmem:[%s632_s4 + $0x40] sm:$0xff] %v233_v5  ;;  %v206_v8 = vmax.f32 %v138_v0, 0.0  ;;  %v214_v9 = vmax.f32 %v178_v1, 0.0 }
  0xff   :  { %v205_v10 = vmax.f32 %v133_v6, 0.0  ;;  %v334_v12 = vpop.f32.mrb[4].mxu0  ;;  %v346_v13 = vpop.f32.mrb[4].mxu1 }
 0x100   :  { %v213_v11 = vmax.f32 %v173_v7, 0.0  ;;  %v228_v14 = vsel %vm224_vm1, %v206_v8, %v138_v0  ;;  %v236_v15 = vsel %vm224_vm1, %v214_v9, %v178_v1  ;;  %v148_v16 = vadd.f32 %v334_v12, %v527_v46  ;;  %v142_v18 = vpop.f32.mrb[5].mxu0  ;;  %v182_v19 = vpop.f32.mrb[5].mxu1 }
 0x101   :  { %v188_v17 = vadd.f32 %v346_v13, %v527_v46  ;;  %244 = vst [vmem:[%s632_s4 + $0x18] sm:$0xff] %v228_v14  ;;  %252 = vst [vmem:[%s632_s4 + $0x58] sm:$0xff] %v236_v15  ;;  %v227_v20 = vsel %vm224_vm1, %v205_v10, %v133_v6  ;;  %v143_v22 = vadd.f32 %v527_v46, %v142_v18 }
 0x102   :  { %v235_v21 = vsel %vm224_vm1, %v213_v11, %v173_v7  ;;  %v183_v23 = vadd.f32 %v527_v46, %v182_v19  ;;  %243 = vst [vmem:[%s632_s4 + $0x10] sm:$0xff] %v227_v20  ;;  %v208_v24 = vmax.f32 %v148_v16, 0.0 }
 0x103   :  { %251 = vst [vmem:[%s632_s4 + $0x50] sm:$0xff] %v235_v21  ;;  %v216_v25 = vmax.f32 %v188_v17, 0.0  ;;  %v207_v26 = vmax.f32 %v143_v22, 0.0  ;;  %v337_v28 = vpop.f32.mrb[6].mxu0  ;;  %v349_v29 = vpop.f32.mrb[6].mxu1 }
 0x104   :  { %v215_v27 = vmax.f32 %v183_v23, 0.0  ;;  %v230_v30 = vsel %vm224_vm1, %v208_v24, %v148_v16  ;;  %v158_v32 = vadd.f32 %v337_v28, %v527_v46  ;;  %v198_v33 = vadd.f32 %v349_v29, %v527_v46  ;;  %v152_v34 = vpop.f32.mrb[7].mxu0  ;;  %v192_v35 = vpop.f32.mrb[7].mxu1 }
 0x105   :  { %v238_v31 = vsel %vm224_vm1, %v216_v25, %v188_v17  ;;  %246 = vst [vmem:[%s632_s4 + $0x28] sm:$0xff] %v230_v30  ;;  %v229_v36 = vsel %vm224_vm1, %v207_v26, %v143_v22  ;;  %v153_v38 = vadd.f32 %v527_v46, %v152_v34  ;;  %v193_v39 = vadd.f32 %v527_v46, %v192_v35 }
 0x106   :  { %254 = vst [vmem:[%s632_s4 + $0x68] sm:$0xff] %v238_v31  ;;  %v237_v37 = vsel %vm224_vm1, %v215_v27, %v183_v23  ;;  %245 = vst [vmem:[%s632_s4 + $0x20] sm:$0xff] %v229_v36  ;;  %v210_v40 = vmax.f32 %v158_v32, 0.0  ;;  %v218_v41 = vmax.f32 %v198_v33, 0.0 }
 0x107   :  { %253 = vst [vmem:[%s632_s4 + $0x60] sm:$0xff] %v237_v37  ;;  %v209_v42 = vmax.f32 %v153_v38, 0.0  ;;  %v217_v43 = vmax.f32 %v193_v39, 0.0 }
 0x108   :  { %v232_v44 = vsel %vm224_vm1, %v210_v40, %v158_v32  ;;  %v240_v45 = vsel %vm224_vm1, %v218_v41, %v198_v33 }
 0x109   :  { %248 = vst [vmem:[%s632_s4 + $0x38] sm:$0xff] %v232_v44  ;;  %256 = vst [vmem:[%s632_s4 + $0x78] sm:$0xff] %v240_v45  ;;  %v231_v46 = vsel %vm224_vm1, %v209_v42, %v153_v38  ;;  %v239_v48 = vsel %vm224_vm1, %v217_v43, %v193_v39 }
 0x10a   :  { %247 = vst [vmem:[%s632_s4 + $0x30] sm:$0xff] %v231_v46  ;;  %255 = vst [vmem:[%s632_s4 + $0x70] sm:$0xff] %v239_v48 }

// kernel: _lambda_.13
= control target key start
LH: loop header
LB: loop body
LE: loop exit
PB: predicated region body
PF: predicated region fallthrough
CT: control target
= control target key end

     0   :  { %s644_s1 = inlined_call_operand.vmem [shape: f32[128,128], index: 1, kind: input, shape index: {}]   ;;  %s645_s0 = inlined_call_operand.vmem [shape: f32[128,128], index: 0, kind: input, shape index: {}]   ;;  %s646_s2 = inlined_call_operand.vmem [shape: f32[1,128], index: 2, kind: input, shape index: {}]   ;;  %s647_s3 = inlined_call_operand.vmem [shape: f32[128,128], index: 3, kind: input, shape index: {}]   ;;  %s648_s4 = inlined_call_operand.vmem [shape: f32[128,128], index: 4, kind: output, shape index: {}]  }
   0x1   :  { %v33_v0 = vld [vmem:[%s644_s1] sm:$0xff]  ;;  %v34_v1 = vld [vmem:[%s644_s1 + $0x8] sm:$0xff]  ;;  %v35_v2 = vld [vmem:[%s644_s1 + $0x10] sm:$0xff] }
   0x2   :  { %v358_v3 = vpack.c.bf16 %v34_v1, %v33_v0  ;;  %v36_v4 = vld [vmem:[%s644_s1 + $0x18] sm:$0xff]  ;;  %v37_v6 = vld [vmem:[%s644_s1 + $0x20] sm:$0xff]  ;;  %v38_v7 = vld [vmem:[%s644_s1 + $0x28] sm:$0xff] }
   0x3   :  { %v362_v5 = vpack.c.bf16 %v36_v4, %v35_v2  ;;  %v366_v8 = vpack.c.bf16 %v38_v7, %v37_v6  ;;  %v17_v9 = vld [vmem:[%s645_s0] sm:$0xff]  ;;  %v39_v11 = vld [vmem:[%s644_s1 + $0x30] sm:$0xff]  ;;  %v40_v12 = vld [vmem:[%s644_s1 + $0x38] sm:$0xff] }
   0x4   :  { %359 = vmatprep.subr.bf16.mxu0 %v358_v3  ;;  %390 = vmatprep.subr.bf16.mxu1 %v358_v3  ;;  %v25_v10 = vld [vmem:[%s645_s0 + $0x40] sm:$0xff]  ;;  %v370_v13 = vpack.c.bf16 %v40_v12, %v39_v11  ;;  %v42_v15 = vld [vmem:[%s644_s1 + $0x48] sm:$0xff]  ;;  %v43_v17 = vld [vmem:[%s644_s1 + $0x50] sm:$0xff] }
   0x5   :  { %361 = vmatpush3.bf16.msra.mxu0 %v358_v3  ;;  %398 = vmatpush3.bf16.msra.mxu1 %v358_v3  ;;  %v41_v14 = vld [vmem:[%s644_s1 + $0x40] sm:$0xff]  ;;  %v44_v18 = vld [vmem:[%s644_s1 + $0x58] sm:$0xff]  ;;  %v46_v21 = vld [vmem:[%s644_s1 + $0x68] sm:$0xff] }
   0x6   :  { %363 = vmatprep.subr.bf16.mxu0 %v362_v5  ;;  %391 = vmatprep.subr.bf16.mxu1 %v362_v5  ;;  %v374_v16 = vpack.c.bf16 %v42_v15, %v41_v14  ;;  %v378_v19 = vpack.c.bf16 %v44_v18, %v43_v17  ;;  %v45_v20 = vld [vmem:[%s644_s1 + $0x60] sm:$0xff]  ;;  %v47_v23 = vld [vmem:[%s644_s1 + $0x70] sm:$0xff]  ;;  %v48_v24 = vld [vmem:[%s644_s1 + $0x78] sm:$0xff] }
   0x7   :  { %334 = vmatprep.mubr.f32.mxu0 %v17_v9  ;;  %346 = vmatprep.mubr.f32.mxu1 %v25_v10  ;;  %v382_v22 = vpack.c.bf16 %v46_v21, %v45_v20  ;;  %v386_v25 = vpack.c.bf16 %v48_v24, %v47_v23  ;;  %v18_v26 = vld [vmem:[%s645_s0 + $0x8] sm:$0xff]  ;;  %v19_v28 = vld [vmem:[%s645_s0 + $0x10] sm:$0xff]  ;;  %v20_v30 = vld [vmem:[%s645_s0 + $0x18] sm:$0xff] }
   0x8   :  { %v26_v27 = vld [vmem:[%s645_s0 + $0x48] sm:$0xff]  ;;  %v27_v29 = vld [vmem:[%s645_s0 + $0x50] sm:$0xff]  ;;  %v28_v31 = vld [vmem:[%s645_s0 + $0x58] sm:$0xff] }
   0x9   :  { %365 = vmatpush3.bf16.msra.mxu0 %v362_v5  ;;  %399 = vmatpush3.bf16.msra.mxu1 %v362_v5  ;;  %v21_v32 = vld [vmem:[%s645_s0 + $0x20] sm:$0xff]  ;;  %v22_v34 = vld [vmem:[%s645_s0 + $0x28] sm:$0xff]  ;;  %v23_v36 = vld [vmem:[%s645_s0 + $0x30] sm:$0xff] }
   0xa   :  { %367 = vmatprep.subr.bf16.mxu0 %v366_v8  ;;  %392 = vmatprep.subr.bf16.mxu1 %v366_v8  ;;  %v29_v33 = vld [vmem:[%s645_s0 + $0x60] sm:$0xff]  ;;  %v30_v35 = vld [vmem:[%s645_s0 + $0x68] sm:$0xff]  ;;  %v31_v37 = vld [vmem:[%s645_s0 + $0x70] sm:$0xff] }
   0xb   :  { %v24_v38 = vld [vmem:[%s645_s0 + $0x38] sm:$0xff]  ;;  %v530_v40 = vld [vmem:[%s646_s2] ss:$0 sm:$0xff]  ;;  %v202_v42 = vld [vmem:[%s647_s3 + $0x8] sm:$0xff] }
   0xc   :  { %v32_v39 = vld [vmem:[%s645_s0 + $0x78] sm:$0xff]  ;;  %v210_v44 = vld [vmem:[%s647_s3 + $0x48] sm:$0xff]  ;;  %v201_v48 = vld [vmem:[%s647_s3] sm:$0xff] }
   0xd   :  { %369 = vmatpush3.bf16.msra.mxu0 %v366_v8  ;;  %400 = vmatpush3.bf16.msra.mxu1 %v366_v8  ;;  %v209_v50 = vld [vmem:[%s647_s3 + $0x40] sm:$0xff]  ;;  %v204_v58 = vld [vmem:[%s647_s3 + $0x18] sm:$0xff]  ;;  %v203_v2 = vld [vmem:[%s647_s3 + $0x10] sm:$0xff] }
   0xe   :  { %371 = vmatprep.subr.bf16.mxu0 %v370_v13  ;;  %393 = vmatprep.subr.bf16.mxu1 %v370_v13  ;;  %v212_v60 = vld [vmem:[%s647_s3 + $0x58] sm:$0xff]  ;;  %v211_v4 = vld [vmem:[%s647_s3 + $0x50] sm:$0xff]  ;;  %v206_v14 = vld [vmem:[%s647_s3 + $0x28] sm:$0xff] }
   0xf   :  { %v213_v24 = vld [vmem:[%s647_s3 + $0x60] sm:$0xff] }
  0x11   :  { %373 = vmatpush3.bf16.msra.mxu0 %v370_v13  ;;  %401 = vmatpush3.bf16.msra.mxu1 %v370_v13 }
  0x12   :  { %375 = vmatprep.subr.bf16.mxu0 %v374_v16  ;;  %394 = vmatprep.subr.bf16.mxu1 %v374_v16 }
  0x15   :  { %377 = vmatpush3.bf16.msra.mxu0 %v374_v16  ;;  %402 = vmatpush3.bf16.msra.mxu1 %v374_v16  ;;  %v214_v16 = vld [vmem:[%s647_s3 + $0x68] sm:$0xff] }
  0x16   :  { %379 = vmatprep.subr.bf16.mxu0 %v378_v19  ;;  %395 = vmatprep.subr.bf16.mxu1 %v378_v19 }
  0x19   :  { %381 = vmatpush3.bf16.msra.mxu0 %v378_v19  ;;  %403 = vmatpush3.bf16.msra.mxu1 %v378_v19 }
  0x1a   :  { %383 = vmatprep.subr.bf16.mxu0 %v382_v22  ;;  %396 = vmatprep.subr.bf16.mxu1 %v382_v22 }
  0x1d   :  { %385 = vmatpush3.bf16.msra.mxu0 %v382_v22  ;;  %404 = vmatpush3.bf16.msra.mxu1 %v382_v22  ;;  %v205_v22 = vld [vmem:[%s647_s3 + $0x20] sm:$0xff] }
  0x1e   :  { %387 = vmatprep.subr.bf16.mxu0 %v386_v25  ;;  %397 = vmatprep.subr.bf16.mxu1 %v386_v25 }
  0x21   :  { %389 = vmatpush3.bf16.msra.mxu0 %v386_v25  ;;  %405 = vmatpush3.bf16.msra.mxu1 %v386_v25 }
  0x24   :  { %335 = vmatmul.mubr.f32.vlgmr.msra.gmra.mrb[0].mxu0 %v18_v26  ;;  %347 = vmatmul.mubr.f32.vlgmr.msra.gmra.mrb[0].mxu1 %v26_v27 }
  0x25   :  { %337 = vmatprep.mubr.f32.mxu0 %v19_v28  ;;  %349 = vmatprep.mubr.f32.mxu1 %v27_v29 }
  0x28   :  { %338 = vmatmul.mubr.f32.gmra.mrb[2].mxu0 %v20_v30  ;;  %350 = vmatmul.mubr.f32.gmra.mrb[2].mxu1 %v28_v31 }
  0x29   :  { %340 = vmatprep.mubr.f32.mxu0 %v21_v32  ;;  %352 = vmatprep.mubr.f32.mxu1 %v29_v33 }
  0x2c   :  { %341 = vmatmul.mubr.f32.gmra.mrb[4].mxu0 %v22_v34  ;;  %353 = vmatmul.mubr.f32.gmra.mrb[4].mxu1 %v30_v35  ;;  %v208_v34 = vld [vmem:[%s647_s3 + $0x38] sm:$0xff] }
  0x2d   :  { %343 = vmatprep.mubr.f32.mxu0 %v23_v36  ;;  %355 = vmatprep.mubr.f32.mxu1 %v31_v37  ;;  %v216_v36 = vld [vmem:[%s647_s3 + $0x78] sm:$0xff] }
  0x30   :  { %344 = vmatmul.mubr.f32.gmra.mrb[6].mxu0 %v24_v38  ;;  %356 = vmatmul.mubr.f32.gmra.mrb[6].mxu1 %v32_v39 }
  0xf7   :  { %v336_v41 = vpop.f32.mrb[0].mxu0  ;;  %v348_v43 = vpop.f32.mrb[0].mxu1 }
  0xf8   :  { %v128_v45 = vadd.f32 %v336_v41, %v530_v40  ;;  %v168_v46 = vadd.f32 %v348_v43, %v530_v40  ;;  %v122_v47 = vpop.f32.mrb[1].mxu0  ;;  %v162_v49 = vpop.f32.mrb[1].mxu1  ;;  %v207_v43 = vld [vmem:[%s647_s3 + $0x30] sm:$0xff] }
  0xf9   :  { %v123_v51 = vadd.f32 %v530_v40, %v122_v47  ;;  %v163_v52 = vadd.f32 %v530_v40, %v162_v49 }
  0xfa   :  { %v218_v53 = vadd.f32 %v202_v42, %v128_v45  ;;  %v226_v54 = vadd.f32 %v210_v44, %v168_v46  ;;  %v215_v45 = vld [vmem:[%s647_s3 + $0x70] sm:$0xff] }
  0xfb   :  { %v217_v55 = vadd.f32 %v201_v48, %v123_v51  ;;  %v225_v56 = vadd.f32 %v209_v50, %v163_v52  ;;  %v339_v57 = vpop.f32.mrb[2].mxu0  ;;  %v351_v59 = vpop.f32.mrb[2].mxu1 }
  0xfc   :  { %v234_v61 = vmax.f32 %v218_v53, 0.0  ;;  %v242_v62 = vmax.f32 %v226_v54, 0.0  ;;  %v138_v63 = vadd.f32 %v339_v57, %v530_v40  ;;  %v178_v0 = vadd.f32 %v351_v59, %v530_v40  ;;  %v132_v1 = vpop.f32.mrb[3].mxu0  ;;  %v172_v3 = vpop.f32.mrb[3].mxu1 }
  0xfd   :  { %v233_v5 = vmax.f32 %v217_v55, 0.0  ;;  %v241_v6 = vmax.f32 %v225_v56, 0.0  ;;  %v133_v7 = vadd.f32 %v530_v40, %v132_v1  ;;  %v173_v8 = vadd.f32 %v530_v40, %v172_v3 }
  0xfe   :  { %250 = vst [vmem:[%s648_s4 + $0x8] sm:$0xff] %v234_v61  ;;  %258 = vst [vmem:[%s648_s4 + $0x48] sm:$0xff] %v242_v62  ;;  %v220_v9 = vadd.f32 %v204_v58, %v138_v63  ;;  %v228_v10 = vadd.f32 %v212_v60, %v178_v0 }
  0xff   :  { %249 = vst [vmem:[%s648_s4] sm:$0xff] %v233_v5  ;;  %257 = vst [vmem:[%s648_s4 + $0x40] sm:$0xff] %v241_v6  ;;  %v219_v11 = vadd.f32 %v203_v2, %v133_v7  ;;  %v227_v12 = vadd.f32 %v211_v4, %v173_v8  ;;  %v342_v13 = vpop.f32.mrb[4].mxu0  ;;  %v354_v15 = vpop.f32.mrb[4].mxu1 }
 0x100   :  { %v236_v17 = vmax.f32 %v220_v9, 0.0  ;;  %v244_v18 = vmax.f32 %v228_v10, 0.0  ;;  %v148_v19 = vadd.f32 %v342_v13, %v530_v40  ;;  %v188_v20 = vadd.f32 %v354_v15, %v530_v40  ;;  %v142_v21 = vpop.f32.mrb[5].mxu0  ;;  %v182_v23 = vpop.f32.mrb[5].mxu1 }
 0x101   :  { %v235_v25 = vmax.f32 %v219_v11, 0.0  ;;  %v243_v26 = vmax.f32 %v227_v12, 0.0  ;;  %v143_v27 = vadd.f32 %v530_v40, %v142_v21  ;;  %v183_v28 = vadd.f32 %v530_v40, %v182_v23 }
 0x102   :  { %252 = vst [vmem:[%s648_s4 + $0x18] sm:$0xff] %v236_v17  ;;  %260 = vst [vmem:[%s648_s4 + $0x58] sm:$0xff] %v244_v18  ;;  %v222_v29 = vadd.f32 %v206_v14, %v148_v19  ;;  %v230_v30 = vadd.f32 %v214_v16, %v188_v20 }
 0x103   :  { %251 = vst [vmem:[%s648_s4 + $0x10] sm:$0xff] %v235_v25  ;;  %259 = vst [vmem:[%s648_s4 + $0x50] sm:$0xff] %v243_v26  ;;  %v221_v31 = vadd.f32 %v205_v22, %v143_v27  ;;  %v229_v32 = vadd.f32 %v213_v24, %v183_v28  ;;  %v345_v33 = vpop.f32.mrb[6].mxu0  ;;  %v357_v35 = vpop.f32.mrb[6].mxu1 }
 0x104   :  { %v238_v37 = vmax.f32 %v222_v29, 0.0  ;;  %v246_v38 = vmax.f32 %v230_v30, 0.0  ;;  %v158_v39 = vadd.f32 %v345_v33, %v530_v40  ;;  %v198_v41 = vadd.f32 %v357_v35, %v530_v40  ;;  %v152_v42 = vpop.f32.mrb[7].mxu0  ;;  %v192_v44 = vpop.f32.mrb[7].mxu1 }
 0x105   :  { %v237_v46 = vmax.f32 %v221_v31, 0.0  ;;  %v245_v47 = vmax.f32 %v229_v32, 0.0  ;;  %v153_v48 = vadd.f32 %v530_v40, %v152_v42  ;;  %v193_v49 = vadd.f32 %v530_v40, %v192_v44 }
 0x106   :  { %254 = vst [vmem:[%s648_s4 + $0x28] sm:$0xff] %v238_v37  ;;  %262 = vst [vmem:[%s648_s4 + $0x68] sm:$0xff] %v246_v38  ;;  %v224_v50 = vadd.f32 %v208_v34, %v158_v39  ;;  %v232_v51 = vadd.f32 %v216_v36, %v198_v41 }
 0x107   :  { %253 = vst [vmem:[%s648_s4 + $0x20] sm:$0xff] %v237_v46  ;;  %261 = vst [vmem:[%s648_s4 + $0x60] sm:$0xff] %v245_v47  ;;  %v223_v52 = vadd.f32 %v207_v43, %v153_v48  ;;  %v231_v40 = vadd.f32 %v215_v45, %v193_v49 }
 0x108   :  { %v240_v53 = vmax.f32 %v224_v50, 0.0  ;;  %v248_v54 = vmax.f32 %v232_v51, 0.0 }
 0x109   :  { %v239_v55 = vmax.f32 %v223_v52, 0.0  ;;  %v247_v56 = vmax.f32 %v231_v40, 0.0 }
 0x10a   :  { %256 = vst [vmem:[%s648_s4 + $0x38] sm:$0xff] %v240_v53  ;;  %264 = vst [vmem:[%s648_s4 + $0x78] sm:$0xff] %v248_v54 }
 0x10b   :  { %255 = vst [vmem:[%s648_s4 + $0x30] sm:$0xff] %v239_v55  ;;  %263 = vst [vmem:[%s648_s4 + $0x70] sm:$0xff] %v247_v56 }

// kernel: _lambda_.14
= control target key start
LH: loop header
LB: loop body
LE: loop exit
PB: predicated region body
PF: predicated region fallthrough
CT: control target
= control target key end

     0   :  { %s538_s1 = inlined_call_operand.vmem [shape: f32[128,128], index: 1, kind: input, shape index: {}]   ;;  %s539_s0 = inlined_call_operand.vmem [shape: f32[128,128], index: 0, kind: input, shape index: {}]   ;;  %s540_s2 = inlined_call_operand.vmem [shape: f32[1,128], index: 2, kind: input, shape index: {}]   ;;  %s541_s3 = inlined_call_operand.vmem [shape: f32[128,128], index: 3, kind: output, shape index: {}]  }
   0x1   :  { %v30_v0 = vld [vmem:[%s538_s1] sm:$0xff]  ;;  %v31_v1 = vld [vmem:[%s538_s1 + $0x8] sm:$0xff]  ;;  %v32_v2 = vld [vmem:[%s538_s1 + $0x10] sm:$0xff] }
   0x2   :  { %v323_v3 = vpack.c.bf16 %v31_v1, %v30_v0  ;;  %v33_v4 = vld [vmem:[%s538_s1 + $0x18] sm:$0xff]  ;;  %v34_v6 = vld [vmem:[%s538_s1 + $0x20] sm:$0xff]  ;;  %v35_v7 = vld [vmem:[%s538_s1 + $0x28] sm:$0xff] }
   0x3   :  { %v327_v5 = vpack.c.bf16 %v33_v4, %v32_v2  ;;  %v331_v8 = vpack.c.bf16 %v35_v7, %v34_v6  ;;  %v14_v9 = vld [vmem:[%s539_s0] sm:$0xff]  ;;  %v36_v11 = vld [vmem:[%s538_s1 + $0x30] sm:$0xff]  ;;  %v37_v12 = vld [vmem:[%s538_s1 + $0x38] sm:$0xff] }
   0x4   :  { %324 = vmatprep.subr.bf16.mxu0 %v323_v3  ;;  %355 = vmatprep.subr.bf16.mxu1 %v323_v3  ;;  %v22_v10 = vld [vmem:[%s539_s0 + $0x40] sm:$0xff]  ;;  %v335_v13 = vpack.c.bf16 %v37_v12, %v36_v11  ;;  %v39_v15 = vld [vmem:[%s538_s1 + $0x48] sm:$0xff]  ;;  %v40_v17 = vld [vmem:[%s538_s1 + $0x50] sm:$0xff] }
   0x5   :  { %326 = vmatpush3.bf16.msra.mxu0 %v323_v3  ;;  %363 = vmatpush3.bf16.msra.mxu1 %v323_v3  ;;  %v38_v14 = vld [vmem:[%s538_s1 + $0x40] sm:$0xff]  ;;  %v41_v18 = vld [vmem:[%s538_s1 + $0x58] sm:$0xff]  ;;  %v43_v21 = vld [vmem:[%s538_s1 + $0x68] sm:$0xff] }
   0x6   :  { %328 = vmatprep.subr.bf16.mxu0 %v327_v5  ;;  %356 = vmatprep.subr.bf16.mxu1 %v327_v5  ;;  %v339_v16 = vpack.c.bf16 %v39_v15, %v38_v14  ;;  %v343_v19 = vpack.c.bf16 %v41_v18, %v40_v17  ;;  %v42_v20 = vld [vmem:[%s538_s1 + $0x60] sm:$0xff]  ;;  %v44_v23 = vld [vmem:[%s538_s1 + $0x70] sm:$0xff]  ;;  %v45_v24 = vld [vmem:[%s538_s1 + $0x78] sm:$0xff] }
   0x7   :  { %299 = vmatprep.mubr.f32.mxu0 %v14_v9  ;;  %311 = vmatprep.mubr.f32.mxu1 %v22_v10  ;;  %v347_v22 = vpack.c.bf16 %v43_v21, %v42_v20  ;;  %v351_v25 = vpack.c.bf16 %v45_v24, %v44_v23  ;;  %v15_v26 = vld [vmem:[%s539_s0 + $0x8] sm:$0xff]  ;;  %v16_v28 = vld [vmem:[%s539_s0 + $0x10] sm:$0xff]  ;;  %v17_v30 = vld [vmem:[%s539_s0 + $0x18] sm:$0xff] }
   0x8   :  { %v23_v27 = vld [vmem:[%s539_s0 + $0x48] sm:$0xff]  ;;  %v24_v29 = vld [vmem:[%s539_s0 + $0x50] sm:$0xff]  ;;  %v25_v31 = vld [vmem:[%s539_s0 + $0x58] sm:$0xff] }
   0x9   :  { %330 = vmatpush3.bf16.msra.mxu0 %v327_v5  ;;  %364 = vmatpush3.bf16.msra.mxu1 %v327_v5  ;;  %v18_v32 = vld [vmem:[%s539_s0 + $0x20] sm:$0xff]  ;;  %v19_v34 = vld [vmem:[%s539_s0 + $0x28] sm:$0xff]  ;;  %v20_v36 = vld [vmem:[%s539_s0 + $0x30] sm:$0xff] }
   0xa   :  { %332 = vmatprep.subr.bf16.mxu0 %v331_v8  ;;  %357 = vmatprep.subr.bf16.mxu1 %v331_v8  ;;  %v26_v33 = vld [vmem:[%s539_s0 + $0x60] sm:$0xff]  ;;  %v27_v35 = vld [vmem:[%s539_s0 + $0x68] sm:$0xff]  ;;  %v28_v37 = vld [vmem:[%s539_s0 + $0x70] sm:$0xff] }
   0xb   :  { %v21_v38 = vld [vmem:[%s539_s0 + $0x38] sm:$0xff]  ;;  %v234_v40 = vld [vmem:[%s540_s2] ss:$0 sm:$0xff] }
   0xc   :  { %v29_v39 = vld [vmem:[%s539_s0 + $0x78] sm:$0xff] }
   0xd   :  { %334 = vmatpush3.bf16.msra.mxu0 %v331_v8  ;;  %365 = vmatpush3.bf16.msra.mxu1 %v331_v8 }
   0xe   :  { %336 = vmatprep.subr.bf16.mxu0 %v335_v13  ;;  %358 = vmatprep.subr.bf16.mxu1 %v335_v13 }
  0x11   :  { %338 = vmatpush3.bf16.msra.mxu0 %v335_v13  ;;  %366 = vmatpush3.bf16.msra.mxu1 %v335_v13 }
  0x12   :  { %340 = vmatprep.subr.bf16.mxu0 %v339_v16  ;;  %359 = vmatprep.subr.bf16.mxu1 %v339_v16 }
  0x15   :  { %342 = vmatpush3.bf16.msra.mxu0 %v339_v16  ;;  %367 = vmatpush3.bf16.msra.mxu1 %v339_v16 }
  0x16   :  { %344 = vmatprep.subr.bf16.mxu0 %v343_v19  ;;  %360 = vmatprep.subr.bf16.mxu1 %v343_v19 }
  0x19   :  { %346 = vmatpush3.bf16.msra.mxu0 %v343_v19  ;;  %368 = vmatpush3.bf16.msra.mxu1 %v343_v19 }
  0x1a   :  { %348 = vmatprep.subr.bf16.mxu0 %v347_v22  ;;  %361 = vmatprep.subr.bf16.mxu1 %v347_v22 }
  0x1d   :  { %350 = vmatpush3.bf16.msra.mxu0 %v347_v22  ;;  %369 = vmatpush3.bf16.msra.mxu1 %v347_v22 }
  0x1e   :  { %352 = vmatprep.subr.bf16.mxu0 %v351_v25  ;;  %362 = vmatprep.subr.bf16.mxu1 %v351_v25 }
  0x21   :  { %354 = vmatpush3.bf16.msra.mxu0 %v351_v25  ;;  %370 = vmatpush3.bf16.msra.mxu1 %v351_v25 }
  0x24   :  { %300 = vmatmul.mubr.f32.vlgmr.msra.gmra.mrb[0].mxu0 %v15_v26  ;;  %312 = vmatmul.mubr.f32.vlgmr.msra.gmra.mrb[0].mxu1 %v23_v27 }
  0x25   :  { %302 = vmatprep.mubr.f32.mxu0 %v16_v28  ;;  %314 = vmatprep.mubr.f32.mxu1 %v24_v29 }
  0x28   :  { %303 = vmatmul.mubr.f32.gmra.mrb[2].mxu0 %v17_v30  ;;  %315 = vmatmul.mubr.f32.gmra.mrb[2].mxu1 %v25_v31 }
  0x29   :  { %305 = vmatprep.mubr.f32.mxu0 %v18_v32  ;;  %317 = vmatprep.mubr.f32.mxu1 %v26_v33 }
  0x2c   :  { %306 = vmatmul.mubr.f32.gmra.mrb[4].mxu0 %v19_v34  ;;  %318 = vmatmul.mubr.f32.gmra.mrb[4].mxu1 %v27_v35 }
  0x2d   :  { %308 = vmatprep.mubr.f32.mxu0 %v20_v36  ;;  %320 = vmatprep.mubr.f32.mxu1 %v28_v37 }
  0x30   :  { %309 = vmatmul.mubr.f32.gmra.mrb[6].mxu0 %v21_v38  ;;  %321 = vmatmul.mubr.f32.gmra.mrb[6].mxu1 %v29_v39 }
  0xf7   :  { %v301_v41 = vpop.f32.mrb[0].mxu0  ;;  %v313_v42 = vpop.f32.mrb[0].mxu1 }
  0xf8   :  { %v125_v43 = vadd.f32 %v301_v41, %v234_v40  ;;  %v165_v44 = vadd.f32 %v313_v42, %v234_v40  ;;  %v119_v45 = vpop.f32.mrb[1].mxu0  ;;  %v159_v46 = vpop.f32.mrb[1].mxu1 }
  0xf9   :  { %v120_v47 = vadd.f32 %v234_v40, %v119_v45  ;;  %v160_v48 = vadd.f32 %v234_v40, %v159_v46 }
  0xfa   :  { %v199_v49 = vmax.f32 %v125_v43, 0.0  ;;  %v207_v50 = vmax.f32 %v165_v44, 0.0 }
  0xfb   :  { %v198_v51 = vmax.f32 %v120_v47, 0.0  ;;  %v206_v52 = vmax.f32 %v160_v48, 0.0  ;;  %v304_v53 = vpop.f32.mrb[2].mxu0  ;;  %v316_v54 = vpop.f32.mrb[2].mxu1 }
  0xfc   :  { %215 = vst [vmem:[%s541_s3 + $0x8] sm:$0xff] %v199_v49  ;;  %223 = vst [vmem:[%s541_s3 + $0x48] sm:$0xff] %v207_v50  ;;  %v135_v55 = vadd.f32 %v304_v53, %v234_v40  ;;  %v175_v56 = vadd.f32 %v316_v54, %v234_v40  ;;  %v129_v57 = vpop.f32.mrb[3].mxu0  ;;  %v169_v58 = vpop.f32.mrb[3].mxu1 }
  0xfd   :  { %214 = vst [vmem:[%s541_s3] sm:$0xff] %v198_v51  ;;  %222 = vst [vmem:[%s541_s3 + $0x40] sm:$0xff] %v206_v52  ;;  %v130_v59 = vadd.f32 %v234_v40, %v129_v57  ;;  %v170_v60 = vadd.f32 %v234_v40, %v169_v58 }
  0xfe   :  { %v201_v61 = vmax.f32 %v135_v55, 0.0  ;;  %v209_v62 = vmax.f32 %v175_v56, 0.0 }
  0xff   :  { %v200_v63 = vmax.f32 %v130_v59, 0.0  ;;  %v208_v0 = vmax.f32 %v170_v60, 0.0  ;;  %v307_v1 = vpop.f32.mrb[4].mxu0  ;;  %v319_v2 = vpop.f32.mrb[4].mxu1 }
 0x100   :  { %217 = vst [vmem:[%s541_s3 + $0x18] sm:$0xff] %v201_v61  ;;  %225 = vst [vmem:[%s541_s3 + $0x58] sm:$0xff] %v209_v62  ;;  %v145_v3 = vadd.f32 %v307_v1, %v234_v40  ;;  %v185_v4 = vadd.f32 %v319_v2, %v234_v40  ;;  %v139_v5 = vpop.f32.mrb[5].mxu0  ;;  %v179_v6 = vpop.f32.mrb[5].mxu1 }
 0x101   :  { %216 = vst [vmem:[%s541_s3 + $0x10] sm:$0xff] %v200_v63  ;;  %224 = vst [vmem:[%s541_s3 + $0x50] sm:$0xff] %v208_v0  ;;  %v140_v7 = vadd.f32 %v234_v40, %v139_v5  ;;  %v180_v8 = vadd.f32 %v234_v40, %v179_v6 }
 0x102   :  { %v203_v9 = vmax.f32 %v145_v3, 0.0  ;;  %v211_v10 = vmax.f32 %v185_v4, 0.0 }
 0x103   :  { %v202_v11 = vmax.f32 %v140_v7, 0.0  ;;  %v210_v12 = vmax.f32 %v180_v8, 0.0  ;;  %v310_v13 = vpop.f32.mrb[6].mxu0  ;;  %v322_v14 = vpop.f32.mrb[6].mxu1 }
 0x104   :  { %219 = vst [vmem:[%s541_s3 + $0x28] sm:$0xff] %v203_v9  ;;  %227 = vst [vmem:[%s541_s3 + $0x68] sm:$0xff] %v211_v10  ;;  %v155_v15 = vadd.f32 %v310_v13, %v234_v40  ;;  %v195_v16 = vadd.f32 %v322_v14, %v234_v40  ;;  %v149_v17 = vpop.f32.mrb[7].mxu0  ;;  %v189_v18 = vpop.f32.mrb[7].mxu1 }
 0x105   :  { %218 = vst [vmem:[%s541_s3 + $0x20] sm:$0xff] %v202_v11  ;;  %226 = vst [vmem:[%s541_s3 + $0x60] sm:$0xff] %v210_v12  ;;  %v150_v19 = vadd.f32 %v234_v40, %v149_v17  ;;  %v190_v20 = vadd.f32 %v234_v40, %v189_v18 }
 0x106   :  { %v205_v21 = vmax.f32 %v155_v15, 0.0  ;;  %v213_v22 = vmax.f32 %v195_v16, 0.0 }
 0x107   :  { %v204_v23 = vmax.f32 %v150_v19, 0.0  ;;  %v212_v24 = vmax.f32 %v190_v20, 0.0 }
 0x108   :  { %221 = vst [vmem:[%s541_s3 + $0x38] sm:$0xff] %v205_v21  ;;  %229 = vst [vmem:[%s541_s3 + $0x78] sm:$0xff] %v213_v22 }
 0x109   :  { %220 = vst [vmem:[%s541_s3 + $0x30] sm:$0xff] %v204_v23  ;;  %228 = vst [vmem:[%s541_s3 + $0x70] sm:$0xff] %v212_v24 }

// kernel: _lambda_.16
= control target key start
LH: loop header
LB: loop body
LE: loop exit
PB: predicated region body
PF: predicated region fallthrough
CT: control target
= control target key end

     0   :  { %v136_v28 = vlaneseq  ;;  %v261_v32 = vmov 0   ;;  %s365_s1 = inlined_call_operand.vmem [shape: f32[128,128], index: 1, kind: input, shape index: {}]   ;;  %s366_s0 = inlined_call_operand.vmem [shape: f32[32,128], index: 0, kind: input, shape index: {}]   ;;  %s367_s3 = inlined_call_operand.vmem [shape: f32[1,128], index: 3, kind: input, shape index: {}]   ;;  %s368_s2 = inlined_call_operand.vmem [shape: f32[1,128], index: 2, kind: input, shape index: {}]   ;;  %s369_s4 = inlined_call_operand.vmem [shape: f32[32,128], index: 4, kind: output, shape index: {}]  }
   0x1   :  { %v21_v0 = vld [vmem:[%s365_s1] sm:$0xff]  ;;  %v22_v1 = vld [vmem:[%s365_s1 + $0x8] sm:$0xff]  ;;  %v23_v2 = vld [vmem:[%s365_s1 + $0x10] sm:$0xff] }
   0x2   :  { %v212_v3 = vpack.c.bf16 %v22_v1, %v21_v0  ;;  %v24_v4 = vld [vmem:[%s365_s1 + $0x18] sm:$0xff]  ;;  %v25_v6 = vld [vmem:[%s365_s1 + $0x20] sm:$0xff]  ;;  %v26_v7 = vld [vmem:[%s365_s1 + $0x28] sm:$0xff]  ;;  %v137_v30 = vshrl.u32 %v136_v28, 7 }
   0x3   :  { %v216_v5 = vpack.c.bf16 %v24_v4, %v23_v2  ;;  %v220_v8 = vpack.c.bf16 %v26_v7, %v25_v6  ;;  %v17_v9 = vld [vmem:[%s366_s0] sm:$0xff]  ;;  %v19_v10 = vld [vmem:[%s366_s0 + $0x10] sm:$0xff]  ;;  %v28_v12 = vld [vmem:[%s365_s1 + $0x38] sm:$0xff] }
   0x4   :  { %213 = vmatprep.subr.bf16.mxu0 %v212_v3  ;;  %244 = vmatprep.subr.bf16.mxu1 %v212_v3  ;;  %v27_v11 = vld [vmem:[%s365_s1 + $0x30] sm:$0xff]  ;;  %v29_v14 = vld [vmem:[%s365_s1 + $0x40] sm:$0xff]  ;;  %v30_v15 = vld [vmem:[%s365_s1 + $0x48] sm:$0xff]  ;;  %v138_v31 = vsub.s32 0, %v137_v30 }
   0x5   :  { %215 = vmatpush3.bf16.msra.mxu0 %v212_v3  ;;  %252 = vmatpush3.bf16.msra.mxu1 %v212_v3  ;;  %v224_v13 = vpack.c.bf16 %v28_v12, %v27_v11  ;;  %v228_v16 = vpack.c.bf16 %v30_v15, %v29_v14  ;;  %v31_v17 = vld [vmem:[%s365_s1 + $0x50] sm:$0xff]  ;;  %v32_v18 = vld [vmem:[%s365_s1 + $0x58] sm:$0xff]  ;;  %v33_v20 = vld [vmem:[%s365_s1 + $0x60] sm:$0xff] }
   0x6   :  { %217 = vmatprep.subr.bf16.mxu0 %v216_v5  ;;  %245 = vmatprep.subr.bf16.mxu1 %v216_v5  ;;  %v232_v19 = vpack.c.bf16 %v32_v18, %v31_v17  ;;  %v34_v21 = vld [vmem:[%s365_s1 + $0x68] sm:$0xff]  ;;  %v35_v23 = vld [vmem:[%s365_s1 + $0x70] sm:$0xff]  ;;  %v36_v24 = vld [vmem:[%s365_s1 + $0x78] sm:$0xff] }
   0x7   :  { %206 = vmatprep.mubr.f32.mxu0 %v17_v9  ;;  %209 = vmatprep.mubr.f32.mxu1 %v19_v10  ;;  %v236_v22 = vpack.c.bf16 %v34_v21, %v33_v20  ;;  %v240_v25 = vpack.c.bf16 %v36_v24, %v35_v23  ;;  %v18_v26 = vld [vmem:[%s366_s0 + $0x8] sm:$0xff]  ;;  %v20_v27 = vld [vmem:[%s366_s0 + $0x18] sm:$0xff]  ;;  %v129_v29 = vld [vmem:[%s367_s3] sm:$0x1] }
   0x8   :  { %vm130_vm0 = vcmp.gt.f32.partialorder %v129_v29, 0.0  ;;  %v153_v34 = vld [vmem:[%s368_s2] ss:$0 sm:$0xff] }
   0x9   :  { %219 = vmatpush3.bf16.msra.mxu0 %v216_v5  ;;  %253 = vmatpush3.bf16.msra.mxu1 %v216_v5  ;;  %v135_v33 = vsel %vm130_vm0, 1, %v261_v32 }
   0xa   :  { %221 = vmatprep.subr.bf16.mxu0 %v220_v8  ;;  %246 = vmatprep.subr.bf16.mxu1 %v220_v8  ;;  %v139_v35 = vrot.slane %v135_v33, %v138_v31 }
   0xc   :  { %vm140_vm1 = vcmp.eq.s32.totalorder %v139_v35, 1 }
   0xd   :  { %223 = vmatpush3.bf16.msra.mxu0 %v220_v8  ;;  %254 = vmatpush3.bf16.msra.mxu1 %v220_v8 }
   0xe   :  { %225 = vmatprep.subr.bf16.mxu0 %v224_v13  ;;  %247 = vmatprep.subr.bf16.mxu1 %v224_v13 }
  0x11   :  { %227 = vmatpush3.bf16.msra.mxu0 %v224_v13  ;;  %255 = vmatpush3.bf16.msra.mxu1 %v224_v13 }
  0x12   :  { %229 = vmatprep.subr.bf16.mxu0 %v228_v16  ;;  %248 = vmatprep.subr.bf16.mxu1 %v228_v16 }
  0x15   :  { %231 = vmatpush3.bf16.msra.mxu0 %v228_v16  ;;  %256 = vmatpush3.bf16.msra.mxu1 %v228_v16 }
  0x16   :  { %233 = vmatprep.subr.bf16.mxu0 %v232_v19  ;;  %249 = vmatprep.subr.bf16.mxu1 %v232_v19 }
  0x19   :  { %235 = vmatpush3.bf16.msra.mxu0 %v232_v19  ;;  %257 = vmatpush3.bf16.msra.mxu1 %v232_v19 }
  0x1a   :  { %237 = vmatprep.subr.bf16.mxu0 %v236_v22  ;;  %250 = vmatprep.subr.bf16.mxu1 %v236_v22 }
  0x1d   :  { %239 = vmatpush3.bf16.msra.mxu0 %v236_v22  ;;  %258 = vmatpush3.bf16.msra.mxu1 %v236_v22 }
  0x1e   :  { %241 = vmatprep.subr.bf16.mxu0 %v240_v25  ;;  %251 = vmatprep.subr.bf16.mxu1 %v240_v25 }
  0x21   :  { %243 = vmatpush3.bf16.msra.mxu0 %v240_v25  ;;  %259 = vmatpush3.bf16.msra.mxu1 %v240_v25 }
  0x24   :  { %207 = vmatmul.mubr.f32.vlgmr.msra.gmra.mrb[0].mxu0 %v18_v26  ;;  %210 = vmatmul.mubr.f32.vlgmr.msra.gmra.mrb[0].mxu1 %v20_v27 }
  0xf7   :  { %v208_v36 = vpop.f32.mrb[0].mxu0  ;;  %v211_v37 = vpop.f32.mrb[0].mxu1 }
  0xf8   :  { %v116_v38 = vadd.f32 %v208_v36, %v153_v34  ;;  %v126_v39 = vadd.f32 %v211_v37, %v153_v34  ;;  %v110_v40 = vpop.f32.mrb[1].mxu0  ;;  %v120_v41 = vpop.f32.mrb[1].mxu1 }
  0xf9   :  { %v111_v42 = vadd.f32 %v153_v34, %v110_v40  ;;  %v121_v43 = vadd.f32 %v153_v34, %v120_v41 }
  0xfa   :  { %v132_v44 = vmax.f32 %v116_v38, 0.0  ;;  %v134_v45 = vmax.f32 %v126_v39, 0.0 }
  0xfb   :  { %v131_v46 = vmax.f32 %v111_v42, 0.0  ;;  %v133_v47 = vmax.f32 %v121_v43, 0.0 }
  0xfc   :  { %v142_v48 = vsel %vm140_vm1, %v132_v44, %v116_v38  ;;  %v144_v49 = vsel %vm140_vm1, %v134_v45, %v126_v39 }
  0xfd   :  { %146 = vst [vmem:[%s369_s4 + $0x8] sm:$0xff] %v142_v48  ;;  %148 = vst [vmem:[%s369_s4 + $0x18] sm:$0xff] %v144_v49  ;;  %v141_v50 = vsel %vm140_vm1, %v131_v46, %v111_v42  ;;  %v143_v51 = vsel %vm140_vm1, %v133_v47, %v121_v43 }
  0xfe   :  { %145 = vst [vmem:[%s369_s4] sm:$0xff] %v141_v50  ;;  %147 = vst [vmem:[%s369_s4 + $0x10] sm:$0xff] %v143_v51 }

// kernel: _lambda_.18
= control target key start
LH: loop header
LB: loop body
LE: loop exit
PB: predicated region body
PF: predicated region fallthrough
CT: control target
= control target key end

     0   :  { %s406_s1 = inlined_call_operand.vmem [shape: f32[256,128], index: 1, kind: input, shape index: {}]   ;;  %s407_s0 = inlined_call_operand.vmem [shape: f32[32,256], index: 0, kind: input, shape index: {}]   ;;  %s408_s2 = inlined_call_operand.vmem [shape: f32[1,128], index: 2, kind: input, shape index: {}]   ;;  %s409_s3 = inlined_call_operand.vmem [shape: f32[32,128], index: 3, kind: output, shape index: {}]  }
   0x1   :  { %v38_v0 = vld [vmem:[%s406_s1 + $0x80] sm:$0xff]  ;;  %v39_v1 = vld [vmem:[%s406_s1 + $0x88] sm:$0xff]  ;;  %v40_v5 = vld [vmem:[%s406_s1 + $0x90] sm:$0xff] }
   0x2   :  { %v22_v2 = vld [vmem:[%s406_s1] sm:$0xff]  ;;  %v203_v3 = vpack.c.bf16 %v39_v1, %v38_v0  ;;  %v23_v4 = vld [vmem:[%s406_s1 + $0x8] sm:$0xff]  ;;  %v41_v6 = vld [vmem:[%s406_s1 + $0x98] sm:$0xff] }
   0x3   :  { %v205_v7 = vpack.c.bf16 %v23_v4, %v22_v2  ;;  %v207_v8 = vpack.c.bf16 %v41_v6, %v40_v5  ;;  %v24_v9 = vld [vmem:[%s406_s1 + $0x10] sm:$0xff]  ;;  %v25_v10 = vld [vmem:[%s406_s1 + $0x18] sm:$0xff]  ;;  %v42_v11 = vld [vmem:[%s406_s1 + $0xa0] sm:$0xff] }
   0x4   :  { %204 = vmatprep.subr.bf16.mxu0 %v203_v3  ;;  %235 = vmatprep.subr.bf16.mxu1 %v203_v3  ;;  %v43_v12 = vld [vmem:[%s406_s1 + $0xa8] sm:$0xff]  ;;  %v209_v13 = vpack.c.bf16 %v25_v10, %v24_v9  ;;  %v26_v15 = vld [vmem:[%s406_s1 + $0x20] sm:$0xff]  ;;  %v44_v17 = vld [vmem:[%s406_s1 + $0xb0] sm:$0xff] }
   0x5   :  { %206 = vmatpush3.bf16.msra.mxu0 %v205_v7  ;;  %243 = vmatpush3.bf16.msra.mxu1 %v205_v7  ;;  %v211_v14 = vpack.c.bf16 %v43_v12, %v42_v11  ;;  %v27_v16 = vld [vmem:[%s406_s1 + $0x28] sm:$0xff]  ;;  %v45_v18 = vld [vmem:[%s406_s1 + $0xb8] sm:$0xff]  ;;  %v28_v21 = vld [vmem:[%s406_s1 + $0x30] sm:$0xff] }
   0x6   :  { %208 = vmatprep.subr.bf16.mxu0 %v207_v8  ;;  %236 = vmatprep.subr.bf16.mxu1 %v207_v8  ;;  %v213_v19 = vpack.c.bf16 %v27_v16, %v26_v15  ;;  %v215_v20 = vpack.c.bf16 %v45_v18, %v44_v17  ;;  %v29_v22 = vld [vmem:[%s406_s1 + $0x38] sm:$0xff]  ;;  %v46_v23 = vld [vmem:[%s406_s1 + $0xc0] sm:$0xff]  ;;  %v47_v24 = vld [vmem:[%s406_s1 + $0xc8] sm:$0xff] }
   0x7   :  { %v15_v25 = vld [vmem:[%s407_s0 + $0x8] sm:$0xff]  ;;  %v217_v27 = vpack.c.bf16 %v29_v22, %v28_v21  ;;  %v219_v28 = vpack.c.bf16 %v47_v24, %v46_v23  ;;  %v30_v29 = vld [vmem:[%s406_s1 + $0x40] sm:$0xff]  ;;  %v48_v31 = vld [vmem:[%s406_s1 + $0xd0] sm:$0xff] }
   0x8   :  { %125 = vmatprep.mubr.f32.mxu0 %v15_v25  ;;  %v19_v26 = vld [vmem:[%s407_s0 + $0x28] sm:$0xff]  ;;  %v49_v32 = vld [vmem:[%s406_s1 + $0xd8] sm:$0xff]  ;;  %v32_v35 = vld [vmem:[%s406_s1 + $0x50] sm:$0xff] }
   0x9   :  { %210 = vmatpush3.bf16.msra.mxu0 %v209_v13  ;;  %244 = vmatpush3.bf16.msra.mxu1 %v209_v13  ;;  %v31_v30 = vld [vmem:[%s406_s1 + $0x48] sm:$0xff]  ;;  %v223_v34 = vpack.c.bf16 %v49_v32, %v48_v31  ;;  %v33_v36 = vld [vmem:[%s406_s1 + $0x58] sm:$0xff]  ;;  %v50_v37 = vld [vmem:[%s406_s1 + $0xe0] sm:$0xff] }
   0xa   :  { %212 = vmatprep.subr.bf16.mxu0 %v211_v14  ;;  %237 = vmatprep.subr.bf16.mxu1 %v211_v14  ;;  %v221_v33 = vpack.c.bf16 %v31_v30, %v30_v29  ;;  %v51_v38 = vld [vmem:[%s406_s1 + $0xe8] sm:$0xff]  ;;  %v225_v39 = vpack.c.bf16 %v33_v36, %v32_v35  ;;  %v34_v41 = vld [vmem:[%s406_s1 + $0x60] sm:$0xff]  ;;  %v52_v43 = vld [vmem:[%s406_s1 + $0xf0] sm:$0xff] }
   0xb   :  { %135 = vmatprep.mubr.f32.mxu1 %v19_v26  ;;  %v227_v40 = vpack.c.bf16 %v51_v38, %v50_v37  ;;  %v35_v42 = vld [vmem:[%s406_s1 + $0x68] sm:$0xff]  ;;  %v53_v44 = vld [vmem:[%s406_s1 + $0xf8] sm:$0xff]  ;;  %v36_v47 = vld [vmem:[%s406_s1 + $0x70] sm:$0xff] }
   0xc   :  { %v229_v45 = vpack.c.bf16 %v35_v42, %v34_v41  ;;  %v231_v46 = vpack.c.bf16 %v53_v44, %v52_v43  ;;  %v37_v48 = vld [vmem:[%s406_s1 + $0x78] sm:$0xff]  ;;  %v14_v50 = vld [vmem:[%s407_s0] sm:$0xff]  ;;  %v16_v54 = vld [vmem:[%s407_s0 + $0x10] sm:$0xff] }
   0xd   :  { %214 = vmatpush3.bf16.msra.mxu0 %v213_v19  ;;  %245 = vmatpush3.bf16.msra.mxu1 %v213_v19  ;;  %v233_v49 = vpack.c.bf16 %v37_v48, %v36_v47  ;;  %v18_v51 = vld [vmem:[%s407_s0 + $0x20] sm:$0xff]  ;;  %v17_v52 = vld [vmem:[%s407_s0 + $0x18] sm:$0xff]  ;;  %v20_v55 = vld [vmem:[%s407_s0 + $0x30] sm:$0xff] }
   0xe   :  { %216 = vmatprep.subr.bf16.mxu0 %v215_v20  ;;  %238 = vmatprep.subr.bf16.mxu1 %v215_v20  ;;  %v21_v53 = vld [vmem:[%s407_s0 + $0x38] sm:$0xff]  ;;  %v158_v58 = vld [vmem:[%s408_s2] ss:$0 sm:$0xff] }
  0x11   :  { %218 = vmatpush3.bf16.msra.mxu0 %v217_v27  ;;  %246 = vmatpush3.bf16.msra.mxu1 %v217_v27 }
  0x12   :  { %220 = vmatprep.subr.bf16.mxu0 %v219_v28  ;;  %239 = vmatprep.subr.bf16.mxu1 %v219_v28 }
  0x15   :  { %222 = vmatpush3.bf16.msra.mxu0 %v221_v33  ;;  %247 = vmatpush3.bf16.msra.mxu1 %v221_v33 }
  0x16   :  { %224 = vmatprep.subr.bf16.mxu0 %v223_v34  ;;  %240 = vmatprep.subr.bf16.mxu1 %v223_v34 }
  0x19   :  { %226 = vmatpush3.bf16.msra.mxu0 %v225_v39  ;;  %248 = vmatpush3.bf16.msra.mxu1 %v225_v39 }
  0x1a   :  { %228 = vmatprep.subr.bf16.mxu0 %v227_v40  ;;  %241 = vmatprep.subr.bf16.mxu1 %v227_v40 }
  0x1d   :  { %230 = vmatpush3.bf16.msra.mxu0 %v229_v45  ;;  %249 = vmatpush3.bf16.msra.mxu1 %v229_v45 }
  0x1e   :  { %232 = vmatprep.subr.bf16.mxu0 %v231_v46  ;;  %242 = vmatprep.subr.bf16.mxu1 %v231_v46 }
  0x21   :  { %234 = vmatpush3.bf16.msra.mxu0 %v233_v49  ;;  %250 = vmatpush3.bf16.msra.mxu1 %v233_v49 }
  0x24   :  { %126 = vmatmul.mubr.f32.vlgmr.msra.gmra.mrb[0].mxu0 %v14_v50  ;;  %136 = vmatmul.mubr.f32.vlgmr.msra.gmra.mrb[0].mxu1 %v18_v51 }
  0x25   :  { %130 = vmatprep.mubr.f32.mxu0 %v17_v52  ;;  %140 = vmatprep.mubr.f32.mxu1 %v21_v53 }
  0x28   :  { %131 = vmatmul.mubr.f32.gmra.mrb[2].mxu0 %v16_v54  ;;  %141 = vmatmul.mubr.f32.gmra.mrb[2].mxu1 %v20_v55 }
  0xf7   :  { %v191_v56 = vpop.f32.mrb[0].mxu0  ;;  %v197_v57 = vpop.f32.mrb[0].mxu1 }
  0xf8   :  { %v192_v59 = vpop.f32.mrb[1].mxu0  ;;  %v198_v60 = vpop.f32.mrb[1].mxu1 }
  0xf9   :  { %v193_v61 = vadd.f32 %v192_v59, %v191_v56  ;;  %v199_v62 = vadd.f32 %v198_v60, %v197_v57 }
  0xfb   :  { %v128_v63 = vadd.f32 %v193_v61, %v158_v58  ;;  %v138_v0 = vadd.f32 %v199_v62, %v158_v58  ;;  %v194_v1 = vpop.f32.mrb[2].mxu0  ;;  %v200_v2 = vpop.f32.mrb[2].mxu1 }
  0xfc   :  { %v195_v3 = vpop.f32.mrb[3].mxu0  ;;  %v201_v4 = vpop.f32.mrb[3].mxu1 }
  0xfd   :  { %v146_v5 = vmax.f32 %v128_v63, 0.0  ;;  %v148_v6 = vmax.f32 %v138_v0, 0.0  ;;  %v196_v7 = vadd.f32 %v195_v3, %v194_v1  ;;  %v202_v8 = vadd.f32 %v201_v4, %v200_v2 }
  0xff   :  { %150 = vst [vmem:[%s409_s3] sm:$0xff] %v146_v5  ;;  %152 = vst [vmem:[%s409_s3 + $0x10] sm:$0xff] %v148_v6  ;;  %v133_v9 = vadd.f32 %v196_v7, %v158_v58  ;;  %v143_v10 = vadd.f32 %v202_v8, %v158_v58 }
 0x101   :  { %v147_v11 = vmax.f32 %v133_v9, 0.0  ;;  %v149_v12 = vmax.f32 %v143_v10, 0.0 }
 0x103   :  { %151 = vst [vmem:[%s409_s3 + $0x8] sm:$0xff] %v147_v11  ;;  %153 = vst [vmem:[%s409_s3 + $0x18] sm:$0xff] %v149_v12 }

// kernel: _lambda_.17
= control target key start
LH: loop header
LB: loop body
LE: loop exit
PB: predicated region body
PF: predicated region fallthrough
CT: control target
= control target key end

     0   :  { %s434_s1 = inlined_call_operand.vmem [shape: f32[256,128], index: 1, kind: input, shape index: {}]   ;;  %s435_s0 = inlined_call_operand.vmem [shape: f32[32,256], index: 0, kind: input, shape index: {}]   ;;  %s436_s2 = inlined_call_operand.vmem [shape: f32[1,128], index: 2, kind: input, shape index: {}]   ;;  %s437_s3 = inlined_call_operand.vmem [shape: f32[32,128], index: 3, kind: input, shape index: {}]   ;;  %s438_s4 = inlined_call_operand.vmem [shape: f32[32,128], index: 4, kind: output, shape index: {}]  }
   0x1   :  { %v41_v0 = vld [vmem:[%s434_s1 + $0x80] sm:$0xff]  ;;  %v42_v1 = vld [vmem:[%s434_s1 + $0x88] sm:$0xff]  ;;  %v43_v5 = vld [vmem:[%s434_s1 + $0x90] sm:$0xff] }
   0x2   :  { %v25_v2 = vld [vmem:[%s434_s1] sm:$0xff]  ;;  %v214_v3 = vpack.c.bf16 %v42_v1, %v41_v0  ;;  %v26_v4 = vld [vmem:[%s434_s1 + $0x8] sm:$0xff]  ;;  %v44_v6 = vld [vmem:[%s434_s1 + $0x98] sm:$0xff] }
   0x3   :  { %v216_v7 = vpack.c.bf16 %v26_v4, %v25_v2  ;;  %v218_v8 = vpack.c.bf16 %v44_v6, %v43_v5  ;;  %v27_v9 = vld [vmem:[%s434_s1 + $0x10] sm:$0xff]  ;;  %v28_v10 = vld [vmem:[%s434_s1 + $0x18] sm:$0xff]  ;;  %v45_v11 = vld [vmem:[%s434_s1 + $0xa0] sm:$0xff] }
   0x4   :  { %215 = vmatprep.subr.bf16.mxu0 %v214_v3  ;;  %246 = vmatprep.subr.bf16.mxu1 %v214_v3  ;;  %v46_v12 = vld [vmem:[%s434_s1 + $0xa8] sm:$0xff]  ;;  %v220_v13 = vpack.c.bf16 %v28_v10, %v27_v9  ;;  %v29_v15 = vld [vmem:[%s434_s1 + $0x20] sm:$0xff]  ;;  %v47_v17 = vld [vmem:[%s434_s1 + $0xb0] sm:$0xff] }
   0x5   :  { %217 = vmatpush3.bf16.msra.mxu0 %v216_v7  ;;  %254 = vmatpush3.bf16.msra.mxu1 %v216_v7  ;;  %v222_v14 = vpack.c.bf16 %v46_v12, %v45_v11  ;;  %v30_v16 = vld [vmem:[%s434_s1 + $0x28] sm:$0xff]  ;;  %v48_v18 = vld [vmem:[%s434_s1 + $0xb8] sm:$0xff]  ;;  %v31_v21 = vld [vmem:[%s434_s1 + $0x30] sm:$0xff] }
   0x6   :  { %219 = vmatprep.subr.bf16.mxu0 %v218_v8  ;;  %247 = vmatprep.subr.bf16.mxu1 %v218_v8  ;;  %v224_v19 = vpack.c.bf16 %v30_v16, %v29_v15  ;;  %v226_v20 = vpack.c.bf16 %v48_v18, %v47_v17  ;;  %v32_v22 = vld [vmem:[%s434_s1 + $0x38] sm:$0xff]  ;;  %v49_v23 = vld [vmem:[%s434_s1 + $0xc0] sm:$0xff]  ;;  %v50_v24 = vld [vmem:[%s434_s1 + $0xc8] sm:$0xff] }
   0x7   :  { %v18_v25 = vld [vmem:[%s435_s0 + $0x8] sm:$0xff]  ;;  %v228_v27 = vpack.c.bf16 %v32_v22, %v31_v21  ;;  %v230_v28 = vpack.c.bf16 %v50_v24, %v49_v23  ;;  %v33_v29 = vld [vmem:[%s434_s1 + $0x40] sm:$0xff]  ;;  %v51_v31 = vld [vmem:[%s434_s1 + $0xd0] sm:$0xff] }
   0x8   :  { %128 = vmatprep.mubr.f32.mxu0 %v18_v25  ;;  %v22_v26 = vld [vmem:[%s435_s0 + $0x28] sm:$0xff]  ;;  %v52_v32 = vld [vmem:[%s434_s1 + $0xd8] sm:$0xff]  ;;  %v35_v35 = vld [vmem:[%s434_s1 + $0x50] sm:$0xff] }
   0x9   :  { %221 = vmatpush3.bf16.msra.mxu0 %v220_v13  ;;  %255 = vmatpush3.bf16.msra.mxu1 %v220_v13  ;;  %v34_v30 = vld [vmem:[%s434_s1 + $0x48] sm:$0xff]  ;;  %v234_v34 = vpack.c.bf16 %v52_v32, %v51_v31  ;;  %v36_v36 = vld [vmem:[%s434_s1 + $0x58] sm:$0xff]  ;;  %v53_v37 = vld [vmem:[%s434_s1 + $0xe0] sm:$0xff] }
   0xa   :  { %223 = vmatprep.subr.bf16.mxu0 %v222_v14  ;;  %248 = vmatprep.subr.bf16.mxu1 %v222_v14  ;;  %v232_v33 = vpack.c.bf16 %v34_v30, %v33_v29  ;;  %v54_v38 = vld [vmem:[%s434_s1 + $0xe8] sm:$0xff]  ;;  %v236_v39 = vpack.c.bf16 %v36_v36, %v35_v35  ;;  %v37_v41 = vld [vmem:[%s434_s1 + $0x60] sm:$0xff]  ;;  %v55_v43 = vld [vmem:[%s434_s1 + $0xf0] sm:$0xff] }
   0xb   :  { %138 = vmatprep.mubr.f32.mxu1 %v22_v26  ;;  %v238_v40 = vpack.c.bf16 %v54_v38, %v53_v37  ;;  %v38_v42 = vld [vmem:[%s434_s1 + $0x68] sm:$0xff]  ;;  %v56_v44 = vld [vmem:[%s434_s1 + $0xf8] sm:$0xff]  ;;  %v39_v47 = vld [vmem:[%s434_s1 + $0x70] sm:$0xff] }
   0xc   :  { %v240_v45 = vpack.c.bf16 %v38_v42, %v37_v41  ;;  %v242_v46 = vpack.c.bf16 %v56_v44, %v55_v43  ;;  %v40_v48 = vld [vmem:[%s434_s1 + $0x78] sm:$0xff]  ;;  %v17_v50 = vld [vmem:[%s435_s0] sm:$0xff]  ;;  %v19_v54 = vld [vmem:[%s435_s0 + $0x10] sm:$0xff] }
   0xd   :  { %225 = vmatpush3.bf16.msra.mxu0 %v224_v19  ;;  %256 = vmatpush3.bf16.msra.mxu1 %v224_v19  ;;  %v244_v49 = vpack.c.bf16 %v40_v48, %v39_v47  ;;  %v21_v51 = vld [vmem:[%s435_s0 + $0x20] sm:$0xff]  ;;  %v20_v52 = vld [vmem:[%s435_s0 + $0x18] sm:$0xff]  ;;  %v23_v55 = vld [vmem:[%s435_s0 + $0x30] sm:$0xff] }
   0xe   :  { %227 = vmatprep.subr.bf16.mxu0 %v226_v20  ;;  %249 = vmatprep.subr.bf16.mxu1 %v226_v20  ;;  %v24_v53 = vld [vmem:[%s435_s0 + $0x38] sm:$0xff]  ;;  %v169_v58 = vld [vmem:[%s436_s2] ss:$0 sm:$0xff]  ;;  %v151_v0 = vld [vmem:[%s437_s3 + $0x10] sm:$0xff] }
   0xf   :  { %v149_v63 = vld [vmem:[%s437_s3] sm:$0xff]  ;;  %v150_v11 = vld [vmem:[%s437_s3 + $0x8] sm:$0xff]  ;;  %v152_v12 = vld [vmem:[%s437_s3 + $0x18] sm:$0xff] }
  0x11   :  { %229 = vmatpush3.bf16.msra.mxu0 %v228_v27  ;;  %257 = vmatpush3.bf16.msra.mxu1 %v228_v27 }
  0x12   :  { %231 = vmatprep.subr.bf16.mxu0 %v230_v28  ;;  %250 = vmatprep.subr.bf16.mxu1 %v230_v28 }
  0x15   :  { %233 = vmatpush3.bf16.msra.mxu0 %v232_v33  ;;  %258 = vmatpush3.bf16.msra.mxu1 %v232_v33 }
  0x16   :  { %235 = vmatprep.subr.bf16.mxu0 %v234_v34  ;;  %251 = vmatprep.subr.bf16.mxu1 %v234_v34 }
  0x19   :  { %237 = vmatpush3.bf16.msra.mxu0 %v236_v39  ;;  %259 = vmatpush3.bf16.msra.mxu1 %v236_v39 }
  0x1a   :  { %239 = vmatprep.subr.bf16.mxu0 %v238_v40  ;;  %252 = vmatprep.subr.bf16.mxu1 %v238_v40 }
  0x1d   :  { %241 = vmatpush3.bf16.msra.mxu0 %v240_v45  ;;  %260 = vmatpush3.bf16.msra.mxu1 %v240_v45 }
  0x1e   :  { %243 = vmatprep.subr.bf16.mxu0 %v242_v46  ;;  %253 = vmatprep.subr.bf16.mxu1 %v242_v46 }
  0x21   :  { %245 = vmatpush3.bf16.msra.mxu0 %v244_v49  ;;  %261 = vmatpush3.bf16.msra.mxu1 %v244_v49 }
  0x24   :  { %129 = vmatmul.mubr.f32.vlgmr.msra.gmra.mrb[0].mxu0 %v17_v50  ;;  %139 = vmatmul.mubr.f32.vlgmr.msra.gmra.mrb[0].mxu1 %v21_v51 }
  0x25   :  { %133 = vmatprep.mubr.f32.mxu0 %v20_v52  ;;  %143 = vmatprep.mubr.f32.mxu1 %v24_v53 }
  0x28   :  { %134 = vmatmul.mubr.f32.gmra.mrb[2].mxu0 %v19_v54  ;;  %144 = vmatmul.mubr.f32.gmra.mrb[2].mxu1 %v23_v55 }
  0xf7   :  { %v202_v56 = vpop.f32.mrb[0].mxu0  ;;  %v208_v57 = vpop.f32.mrb[0].mxu1 }
  0xf8   :  { %v203_v59 = vpop.f32.mrb[1].mxu0  ;;  %v209_v60 = vpop.f32.mrb[1].mxu1 }
  0xf9   :  { %v204_v61 = vadd.f32 %v203_v59, %v202_v56  ;;  %v210_v62 = vadd.f32 %v209_v60, %v208_v57 }
  0xfb   :  { %v131_v1 = vadd.f32 %v204_v61, %v169_v58  ;;  %v141_v2 = vadd.f32 %v210_v62, %v169_v58  ;;  %v205_v3 = vpop.f32.mrb[2].mxu0  ;;  %v211_v4 = vpop.f32.mrb[2].mxu1 }
  0xfc   :  { %v206_v5 = vpop.f32.mrb[3].mxu0  ;;  %v212_v6 = vpop.f32.mrb[3].mxu1 }
  0xfd   :  { %v153_v7 = vadd.f32 %v149_v63, %v131_v1  ;;  %v155_v8 = vadd.f32 %v151_v0, %v141_v2  ;;  %v207_v9 = vadd.f32 %v206_v5, %v205_v3  ;;  %v213_v10 = vadd.f32 %v212_v6, %v211_v4 }
  0xff   :  { %v157_v13 = vmax.f32 %v153_v7, 0.0  ;;  %v159_v14 = vmax.f32 %v155_v8, 0.0  ;;  %v136_v15 = vadd.f32 %v207_v9, %v169_v58  ;;  %v146_v16 = vadd.f32 %v213_v10, %v169_v58 }
 0x101   :  { %161 = vst [vmem:[%s438_s4] sm:$0xff] %v157_v13  ;;  %163 = vst [vmem:[%s438_s4 + $0x10] sm:$0xff] %v159_v14  ;;  %v154_v17 = vadd.f32 %v150_v11, %v136_v15  ;;  %v156_v18 = vadd.f32 %v152_v12, %v146_v16 }
 0x103   :  { %v158_v19 = vmax.f32 %v154_v17, 0.0  ;;  %v160_v20 = vmax.f32 %v156_v18, 0.0 }
 0x105   :  { %162 = vst [vmem:[%s438_s4 + $0x8] sm:$0xff] %v158_v19  ;;  %164 = vst [vmem:[%s438_s4 + $0x18] sm:$0xff] %v160_v20 }

// kernel: _lambda_.20
= control target key start
LH: loop header
LB: loop body
LE: loop exit
PB: predicated region body
PF: predicated region fallthrough
CT: control target
= control target key end

     0   :  { %v132_v50 = vlaneseq  ;;  %v212_v54 = vmov 0   ;;  %s349_s1 = inlined_call_operand.vmem [shape: f32[256,128], index: 1, kind: input, shape index: {}]   ;;  %s350_s0 = inlined_call_operand.vmem [shape: f32[8,256], index: 0, kind: input, shape index: {}]   ;;  %s351_s3 = inlined_call_operand.vmem [shape: f32[1,128], index: 3, kind: input, shape index: {}]   ;;  %s352_s2 = inlined_call_operand.vmem [shape: f32[1,128], index: 2, kind: input, shape index: {}]   ;;  %s353_s4 = inlined_call_operand.vmem [shape: f32[8,128], index: 4, kind: output, shape index: {}]  }
   0x1   :  { %v35_v0 = vld [vmem:[%s349_s1 + $0x80] sm:$0xff]  ;;  %v36_v1 = vld [vmem:[%s349_s1 + $0x88] sm:$0xff]  ;;  %v37_v5 = vld [vmem:[%s349_s1 + $0x90] sm:$0xff] }
   0x2   :  { %v19_v2 = vld [vmem:[%s349_s1] sm:$0xff]  ;;  %v179_v3 = vpack.c.bf16 %v36_v1, %v35_v0  ;;  %v20_v4 = vld [vmem:[%s349_s1 + $0x8] sm:$0xff]  ;;  %v38_v6 = vld [vmem:[%s349_s1 + $0x98] sm:$0xff]  ;;  %v133_v52 = vshrl.u32 %v132_v50, 7 }
   0x3   :  { %v181_v7 = vpack.c.bf16 %v20_v4, %v19_v2  ;;  %v183_v8 = vpack.c.bf16 %v38_v6, %v37_v5  ;;  %v21_v9 = vld [vmem:[%s349_s1 + $0x10] sm:$0xff]  ;;  %v22_v10 = vld [vmem:[%s349_s1 + $0x18] sm:$0xff]  ;;  %v39_v11 = vld [vmem:[%s349_s1 + $0xa0] sm:$0xff] }
   0x4   :  { %180 = vmatprep.subr.bf16.mxu0 %v179_v3  ;;  %v40_v12 = vld [vmem:[%s349_s1 + $0xa8] sm:$0xff]  ;;  %v185_v13 = vpack.c.bf16 %v22_v10, %v21_v9  ;;  %v23_v15 = vld [vmem:[%s349_s1 + $0x20] sm:$0xff]  ;;  %v41_v17 = vld [vmem:[%s349_s1 + $0xb0] sm:$0xff]  ;;  %v134_v53 = vsub.s32 0, %v133_v52 }
   0x5   :  { %182 = vmatpush3.bf16.msra.mxu0 %v181_v7  ;;  %v187_v14 = vpack.c.bf16 %v40_v12, %v39_v11  ;;  %v24_v16 = vld [vmem:[%s349_s1 + $0x28] sm:$0xff]  ;;  %v42_v18 = vld [vmem:[%s349_s1 + $0xb8] sm:$0xff]  ;;  %v25_v21 = vld [vmem:[%s349_s1 + $0x30] sm:$0xff] }
   0x6   :  { %184 = vmatprep.subr.bf16.mxu0 %v183_v8  ;;  %v189_v19 = vpack.c.bf16 %v24_v16, %v23_v15  ;;  %v191_v20 = vpack.c.bf16 %v42_v18, %v41_v17  ;;  %v26_v22 = vld [vmem:[%s349_s1 + $0x38] sm:$0xff]  ;;  %v43_v23 = vld [vmem:[%s349_s1 + $0xc0] sm:$0xff]  ;;  %v44_v24 = vld [vmem:[%s349_s1 + $0xc8] sm:$0xff] }
   0x7   :  { %v18_v25 = vld [vmem:[%s350_s0 + $0x8] sm:$0xff]  ;;  %v193_v26 = vpack.c.bf16 %v26_v22, %v25_v21  ;;  %v195_v27 = vpack.c.bf16 %v44_v24, %v43_v23  ;;  %v27_v28 = vld [vmem:[%s349_s1 + $0x40] sm:$0xff]  ;;  %v45_v30 = vld [vmem:[%s349_s1 + $0xd0] sm:$0xff] }
   0x8   :  { %122 = vmatprep.mubr.f32.mxu0 %v18_v25  ;;  %v28_v29 = vld [vmem:[%s349_s1 + $0x48] sm:$0xff]  ;;  %v46_v31 = vld [vmem:[%s349_s1 + $0xd8] sm:$0xff]  ;;  %v29_v34 = vld [vmem:[%s349_s1 + $0x50] sm:$0xff] }
   0x9   :  { %186 = vmatpush3.bf16.msra.mxu0 %v185_v13  ;;  %v197_v32 = vpack.c.bf16 %v28_v29, %v27_v28  ;;  %v199_v33 = vpack.c.bf16 %v46_v31, %v45_v30  ;;  %v30_v35 = vld [vmem:[%s349_s1 + $0x58] sm:$0xff]  ;;  %v47_v36 = vld [vmem:[%s349_s1 + $0xe0] sm:$0xff]  ;;  %v48_v37 = vld [vmem:[%s349_s1 + $0xe8] sm:$0xff] }
   0xa   :  { %188 = vmatprep.subr.bf16.mxu0 %v187_v14  ;;  %v201_v38 = vpack.c.bf16 %v30_v35, %v29_v34  ;;  %v203_v39 = vpack.c.bf16 %v48_v37, %v47_v36  ;;  %v31_v40 = vld [vmem:[%s349_s1 + $0x60] sm:$0xff]  ;;  %v32_v41 = vld [vmem:[%s349_s1 + $0x68] sm:$0xff]  ;;  %v49_v42 = vld [vmem:[%s349_s1 + $0xf0] sm:$0xff] }
   0xb   :  { %v50_v43 = vld [vmem:[%s349_s1 + $0xf8] sm:$0xff]  ;;  %v205_v44 = vpack.c.bf16 %v32_v41, %v31_v40  ;;  %v33_v46 = vld [vmem:[%s349_s1 + $0x70] sm:$0xff]  ;;  %v17_v49 = vld [vmem:[%s350_s0] sm:$0xff] }
   0xc   :  { %v207_v45 = vpack.c.bf16 %v50_v43, %v49_v42  ;;  %v34_v47 = vld [vmem:[%s349_s1 + $0x78] sm:$0xff]  ;;  %v128_v51 = vld [vmem:[%s351_s3] sm:$0x1] }
   0xd   :  { %190 = vmatpush3.bf16.msra.mxu0 %v189_v19  ;;  %v209_v48 = vpack.c.bf16 %v34_v47, %v33_v46  ;;  %vm129_vm0 = vcmp.gt.f32.partialorder %v128_v51, 0.0  ;;  %v143_v57 = vld [vmem:[%s352_s2] ss:$0 sm:$0xff] }
   0xe   :  { %192 = vmatprep.subr.bf16.mxu0 %v191_v20  ;;  %v131_v55 = vsel %vm129_vm0, 1, %v212_v54 }
   0xf   :  { %v135_v59 = vrot.slane %v131_v55, %v134_v53 }
  0x11   :  { %194 = vmatpush3.bf16.msra.mxu0 %v193_v26  ;;  %vm136_vm1 = vcmp.eq.s32.totalorder %v135_v59, 1 }
  0x12   :  { %196 = vmatprep.subr.bf16.mxu0 %v195_v27 }
  0x15   :  { %198 = vmatpush3.bf16.msra.mxu0 %v197_v32 }
  0x16   :  { %200 = vmatprep.subr.bf16.mxu0 %v199_v33 }
  0x19   :  { %202 = vmatpush3.bf16.msra.mxu0 %v201_v38 }
  0x1a   :  { %204 = vmatprep.subr.bf16.mxu0 %v203_v39 }
  0x1d   :  { %206 = vmatpush3.bf16.msra.mxu0 %v205_v44 }
  0x1e   :  { %208 = vmatprep.subr.bf16.mxu0 %v207_v45 }
  0x21   :  { %210 = vmatpush3.bf16.msra.mxu0 %v209_v48 }
  0x24   :  { %123 = vmatmul.mubr.f32.vlgmr.msra.gmra.mrb[0].mxu0 %v17_v49 }
  0xf7   :  { %v176_v56 = vpop.f32.mrb[0].mxu0 }
  0xf8   :  { %v177_v58 = vpop.f32.mrb[1].mxu0 }
  0xf9   :  { %v178_v60 = vadd.f32 %v177_v58, %v176_v56 }
  0xfb   :  { %v125_v61 = vadd.f32 %v178_v60, %v143_v57 }
  0xfd   :  { %v130_v62 = vmax.f32 %v125_v61, 0.0 }
  0xff   :  { %v137_v63 = vsel %vm136_vm1, %v130_v62, %v125_v61 }
 0x100   :  { %138 = vst [vmem:[%s353_s4] sm:$0xff] %v137_v63 }

// kernel: _lambda_.22
= control target key start
LH: loop header
LB: loop body
LE: loop exit
PB: predicated region body
PF: predicated region fallthrough
CT: control target
= control target key end

     0   :  { %v365_v3 = vmov 0.0|0.0   ;;  %vm366_vm0 = vmmov 0   ;;  %v367_v4 = vmov 0.0   ;;  %s555_s1 = inlined_call_operand.vmem [shape: f32[384,128], index: 1, kind: input, shape index: {}]   ;;  %s556_s0 = inlined_call_operand.vmem [shape: f32[8,384], index: 0, kind: input, shape index: {}]   ;;  %s557_s2 = inlined_call_operand.vmem [shape: f32[1,128], index: 2, kind: input, shape index: {}]   ;;  %s558_s3 = inlined_call_operand.vmem [shape: f32[8,128], index: 3, kind: output, shape index: {}]  }
   0x1   :  { %v33_v0 = vld [vmem:[%s555_s1 + $0x80] sm:$0xff]  ;;  %v34_v1 = vld [vmem:[%s555_s1 + $0x88] sm:$0xff]  ;;  %338 = vmatprep.subr.bf16.mxu1 %v365_v3  ;;  %303 = vmatprep.mubr.msk.f32.mxu1 %vm366_vm0, %v367_v4  ;;  %v35_v7 = vld [vmem:[%s555_s1 + $0x90] sm:$0xff] }
   0x2   :  { %v17_v2 = vld [vmem:[%s555_s1] sm:$0xff]  ;;  %v306_v5 = vpack.c.bf16 %v34_v1, %v33_v0  ;;  %v18_v6 = vld [vmem:[%s555_s1 + $0x8] sm:$0xff]  ;;  %v36_v8 = vld [vmem:[%s555_s1 + $0x98] sm:$0xff] }
   0x3   :  { %v308_v9 = vpack.c.bf16 %v18_v6, %v17_v2  ;;  %v310_v10 = vpack.c.bf16 %v36_v8, %v35_v7  ;;  %v19_v11 = vld [vmem:[%s555_s1 + $0x10] sm:$0xff]  ;;  %v20_v12 = vld [vmem:[%s555_s1 + $0x18] sm:$0xff]  ;;  %v49_v13 = vld [vmem:[%s555_s1 + $0x100] sm:$0xff] }
   0x4   :  { %307 = vmatprep.subr.bf16.mxu0 %v306_v5  ;;  %v50_v14 = vld [vmem:[%s555_s1 + $0x108] sm:$0xff]  ;;  %v37_v15 = vld [vmem:[%s555_s1 + $0xa0] sm:$0xff]  ;;  %v312_v17 = vpack.c.bf16 %v20_v12, %v19_v11  ;;  %v51_v19 = vld [vmem:[%s555_s1 + $0x110] sm:$0xff] }
   0x5   :  { %v38_v16 = vld [vmem:[%s555_s1 + $0xa8] sm:$0xff]  ;;  %309 = vmatpush3.bf16.msra.mxu0 %v308_v9  ;;  %v339_v18 = vpack.c.bf16 %v50_v14, %v49_v13  ;;  %v21_v21 = vld [vmem:[%s555_s1 + $0x20] sm:$0xff]  ;;  %v52_v23 = vld [vmem:[%s555_s1 + $0x118] sm:$0xff] }
   0x6   :  { %311 = vmatprep.subr.bf16.mxu0 %v310_v10  ;;  %v314_v20 = vpack.c.bf16 %v38_v16, %v37_v15  ;;  %v22_v22 = vld [vmem:[%s555_s1 + $0x28] sm:$0xff]  ;;  %v342_v24 = vpack.c.bf16 %v52_v23, %v51_v19  ;;  %v39_v25 = vld [vmem:[%s555_s1 + $0xb0] sm:$0xff]  ;;  %v40_v26 = vld [vmem:[%s555_s1 + $0xb8] sm:$0xff] }
   0x7   :  { %340 = vmatpush3.bf16.msra.mxu1 %v339_v18  ;;  %v53_v27 = vld [vmem:[%s555_s1 + $0x120] sm:$0xff]  ;;  %v54_v28 = vld [vmem:[%s555_s1 + $0x128] sm:$0xff]  ;;  %v316_v29 = vpack.c.bf16 %v22_v22, %v21_v21  ;;  %v318_v30 = vpack.c.bf16 %v40_v26, %v39_v25  ;;  %v23_v31 = vld [vmem:[%s555_s1 + $0x30] sm:$0xff] }
   0x8   :  { %341 = vmatprep.subr.bf16.mxu1 %v365_v3  ;;  %v24_v32 = vld [vmem:[%s555_s1 + $0x38] sm:$0xff]  ;;  %v345_v33 = vpack.c.bf16 %v54_v28, %v53_v27  ;;  %v41_v34 = vld [vmem:[%s555_s1 + $0xc0] sm:$0xff]  ;;  %v42_v35 = vld [vmem:[%s555_s1 + $0xc8] sm:$0xff] }
   0x9   :  { %313 = vmatpush3.bf16.msra.mxu0 %v312_v17  ;;  %v55_v36 = vld [vmem:[%s555_s1 + $0x130] sm:$0xff]  ;;  %v56_v37 = vld [vmem:[%s555_s1 + $0x138] sm:$0xff]  ;;  %v320_v38 = vpack.c.bf16 %v24_v32, %v23_v31  ;;  %v322_v39 = vpack.c.bf16 %v42_v35, %v41_v34  ;;  %v25_v40 = vld [vmem:[%s555_s1 + $0x40] sm:$0xff] }
   0xa   :  { %315 = vmatprep.subr.bf16.mxu0 %v314_v20  ;;  %v26_v41 = vld [vmem:[%s555_s1 + $0x48] sm:$0xff]  ;;  %v348_v42 = vpack.c.bf16 %v56_v37, %v55_v36  ;;  %v43_v43 = vld [vmem:[%s555_s1 + $0xd0] sm:$0xff]  ;;  %v44_v44 = vld [vmem:[%s555_s1 + $0xd8] sm:$0xff] }
   0xb   :  { %343 = vmatpush3.bf16.msra.mxu1 %v342_v24  ;;  %v57_v45 = vld [vmem:[%s555_s1 + $0x140] sm:$0xff]  ;;  %v58_v46 = vld [vmem:[%s555_s1 + $0x148] sm:$0xff]  ;;  %v324_v48 = vpack.c.bf16 %v26_v41, %v25_v40  ;;  %v326_v49 = vpack.c.bf16 %v44_v44, %v43_v43  ;;  %v27_v50 = vld [vmem:[%s555_s1 + $0x50] sm:$0xff] }
   0xc   :  { %344 = vmatprep.subr.bf16.mxu1 %v365_v3  ;;  %v15_v47 = vld [vmem:[%s556_s0 + $0x8] sm:$0xff]  ;;  %v28_v51 = vld [vmem:[%s555_s1 + $0x58] sm:$0xff]  ;;  %v351_v52 = vpack.c.bf16 %v58_v46, %v57_v45  ;;  %v45_v53 = vld [vmem:[%s555_s1 + $0xe0] sm:$0xff] }
   0xd   :  { %317 = vmatpush3.bf16.msra.mxu0 %v316_v29  ;;  %136 = vmatprep.mubr.f32.mxu0 %v15_v47  ;;  %v46_v54 = vld [vmem:[%s555_s1 + $0xe8] sm:$0xff]  ;;  %v59_v55 = vld [vmem:[%s555_s1 + $0x150] sm:$0xff]  ;;  %v60_v56 = vld [vmem:[%s555_s1 + $0x158] sm:$0xff]  ;;  %v328_v57 = vpack.c.bf16 %v28_v51, %v27_v50 }
   0xe   :  { %319 = vmatprep.subr.bf16.mxu0 %v318_v30  ;;  %v330_v58 = vpack.c.bf16 %v46_v54, %v45_v53  ;;  %v29_v59 = vld [vmem:[%s555_s1 + $0x60] sm:$0xff]  ;;  %v30_v60 = vld [vmem:[%s555_s1 + $0x68] sm:$0xff]  ;;  %v354_v61 = vpack.c.bf16 %v60_v56, %v59_v55  ;;  %v47_v62 = vld [vmem:[%s555_s1 + $0xf0] sm:$0xff] }
   0xf   :  { %346 = vmatpush3.bf16.msra.mxu1 %v345_v33  ;;  %v48_v63 = vld [vmem:[%s555_s1 + $0xf8] sm:$0xff]  ;;  %v61_v0 = vld [vmem:[%s555_s1 + $0x160] sm:$0xff]  ;;  %v62_v1 = vld [vmem:[%s555_s1 + $0x168] sm:$0xff]  ;;  %v332_v2 = vpack.c.bf16 %v30_v60, %v29_v59 }
  0x10   :  { %347 = vmatprep.subr.bf16.mxu1 %v365_v3  ;;  %v334_v4 = vpack.c.bf16 %v48_v63, %v47_v62  ;;  %v31_v5 = vld [vmem:[%s555_s1 + $0x70] sm:$0xff]  ;;  %v32_v6 = vld [vmem:[%s555_s1 + $0x78] sm:$0xff]  ;;  %v357_v7 = vpack.c.bf16 %v62_v1, %v61_v0  ;;  %v14_v12 = vld [vmem:[%s556_s0] sm:$0xff] }
  0x11   :  { %321 = vmatpush3.bf16.msra.mxu0 %v320_v38  ;;  %v63_v8 = vld [vmem:[%s555_s1 + $0x170] sm:$0xff]  ;;  %v64_v9 = vld [vmem:[%s555_s1 + $0x178] sm:$0xff]  ;;  %v336_v10 = vpack.c.bf16 %v32_v6, %v31_v5  ;;  %v218_v16 = vld [vmem:[%s557_s2] ss:$0 sm:$0xff] }
  0x12   :  { %323 = vmatprep.subr.bf16.mxu0 %v322_v39  ;;  %v360_v11 = vpack.c.bf16 %v64_v9, %v63_v8  ;;  %v16_v13 = vld [vmem:[%s556_s0 + $0x10] sm:$0xff] }
  0x13   :  { %349 = vmatpush3.bf16.msra.mxu1 %v348_v42 }
  0x14   :  { %350 = vmatprep.subr.bf16.mxu1 %v365_v3 }
  0x15   :  { %325 = vmatpush3.bf16.msra.mxu0 %v324_v48 }
  0x16   :  { %327 = vmatprep.subr.bf16.mxu0 %v326_v49 }
  0x17   :  { %352 = vmatpush3.bf16.msra.mxu1 %v351_v52 }
  0x18   :  { %353 = vmatprep.subr.bf16.mxu1 %v365_v3 }
  0x19   :  { %329 = vmatpush3.bf16.msra.mxu0 %v328_v57 }
  0x1a   :  { %331 = vmatprep.subr.bf16.mxu0 %v330_v58 }
  0x1b   :  { %355 = vmatpush3.bf16.msra.mxu1 %v354_v61 }
  0x1c   :  { %356 = vmatprep.subr.bf16.mxu1 %v365_v3 }
  0x1d   :  { %333 = vmatpush3.bf16.msra.mxu0 %v332_v2 }
  0x1e   :  { %335 = vmatprep.subr.bf16.mxu0 %v334_v4 }
  0x1f   :  { %358 = vmatpush3.bf16.msra.mxu1 %v357_v7 }
  0x20   :  { %359 = vmatprep.subr.bf16.mxu1 %v365_v3 }
  0x21   :  { %337 = vmatpush3.bf16.msra.mxu0 %v336_v10 }
  0x23   :  { %361 = vmatpush3.bf16.msra.mxu1 %v360_v11 }
  0x24   :  { %137 = vmatmul.mubr.f32.vlgmr.msra.gmra.mrb[0].mxu0 %v14_v12 }
  0x26   :  { %304 = vmatmul.mubr.f32.vlgmr.msra.gmra.mrb[0].mxu1 %v16_v13 }
  0xf7   :  { %v251_v14 = vpop.f32.mrb[0].mxu0 }
  0xf8   :  { %v252_v15 = vpop.f32.mrb[1].mxu0 }
  0xf9   :  { %v253_v17 = vadd.f32 %v252_v15, %v251_v14  ;;  %v208_v3 = vpop.f32.mrb[0].mxu1 }
  0xfa   :  { %v305_v18 = vpop.f32.mrb[1].mxu1 }
  0xfb   :  { %v139_v19 = vadd.f32 %v253_v17, %v218_v16 }
  0xfd   :  { %v209_v20 = vadd.f32 %v208_v3, %v139_v19 }
  0xff   :  { %v212_v21 = vmax.f32 %v209_v20, 0.0 }
 0x101   :  { %213 = vst [vmem:[%s558_s3] sm:$0xff] %v212_v21 }

// kernel: _lambda_.21
= control target key start
LH: loop header
LB: loop body
LE: loop exit
PB: predicated region body
PF: predicated region fallthrough
CT: control target
= control target key end

     0   :  { %v370_v3 = vmov 0.0|0.0   ;;  %vm371_vm0 = vmmov 0   ;;  %v372_v4 = vmov 0.0   ;;  %s568_s1 = inlined_call_operand.vmem [shape: f32[384,128], index: 1, kind: input, shape index: {}]   ;;  %s569_s0 = inlined_call_operand.vmem [shape: f32[8,384], index: 0, kind: input, shape index: {}]   ;;  %s570_s2 = inlined_call_operand.vmem [shape: f32[1,128], index: 2, kind: input, shape index: {}]   ;;  %s571_s3 = inlined_call_operand.vmem [shape: f32[8,128], index: 3, kind: input, shape index: {}]   ;;  %s572_s4 = inlined_call_operand.vmem [shape: f32[8,128], index: 4, kind: output, shape index: {}]  }
   0x1   :  { %v36_v0 = vld [vmem:[%s568_s1 + $0x80] sm:$0xff]  ;;  %v37_v1 = vld [vmem:[%s568_s1 + $0x88] sm:$0xff]  ;;  %343 = vmatprep.subr.bf16.mxu1 %v370_v3  ;;  %308 = vmatprep.mubr.msk.f32.mxu1 %vm371_vm0, %v372_v4  ;;  %v38_v7 = vld [vmem:[%s568_s1 + $0x90] sm:$0xff] }
   0x2   :  { %v20_v2 = vld [vmem:[%s568_s1] sm:$0xff]  ;;  %v311_v5 = vpack.c.bf16 %v37_v1, %v36_v0  ;;  %v21_v6 = vld [vmem:[%s568_s1 + $0x8] sm:$0xff]  ;;  %v39_v8 = vld [vmem:[%s568_s1 + $0x98] sm:$0xff] }
   0x3   :  { %v313_v9 = vpack.c.bf16 %v21_v6, %v20_v2  ;;  %v315_v10 = vpack.c.bf16 %v39_v8, %v38_v7  ;;  %v22_v11 = vld [vmem:[%s568_s1 + $0x10] sm:$0xff]  ;;  %v23_v12 = vld [vmem:[%s568_s1 + $0x18] sm:$0xff]  ;;  %v52_v13 = vld [vmem:[%s568_s1 + $0x100] sm:$0xff] }
   0x4   :  { %312 = vmatprep.subr.bf16.mxu0 %v311_v5  ;;  %v53_v14 = vld [vmem:[%s568_s1 + $0x108] sm:$0xff]  ;;  %v40_v15 = vld [vmem:[%s568_s1 + $0xa0] sm:$0xff]  ;;  %v317_v17 = vpack.c.bf16 %v23_v12, %v22_v11  ;;  %v54_v19 = vld [vmem:[%s568_s1 + $0x110] sm:$0xff] }
   0x5   :  { %v41_v16 = vld [vmem:[%s568_s1 + $0xa8] sm:$0xff]  ;;  %314 = vmatpush3.bf16.msra.mxu0 %v313_v9  ;;  %v344_v18 = vpack.c.bf16 %v53_v14, %v52_v13  ;;  %v24_v21 = vld [vmem:[%s568_s1 + $0x20] sm:$0xff]  ;;  %v55_v23 = vld [vmem:[%s568_s1 + $0x118] sm:$0xff] }
   0x6   :  { %316 = vmatprep.subr.bf16.mxu0 %v315_v10  ;;  %v319_v20 = vpack.c.bf16 %v41_v16, %v40_v15  ;;  %v25_v22 = vld [vmem:[%s568_s1 + $0x28] sm:$0xff]  ;;  %v347_v24 = vpack.c.bf16 %v55_v23, %v54_v19  ;;  %v42_v25 = vld [vmem:[%s568_s1 + $0xb0] sm:$0xff]  ;;  %v43_v26 = vld [vmem:[%s568_s1 + $0xb8] sm:$0xff] }
   0x7   :  { %345 = vmatpush3.bf16.msra.mxu1 %v344_v18  ;;  %v56_v27 = vld [vmem:[%s568_s1 + $0x120] sm:$0xff]  ;;  %v57_v28 = vld [vmem:[%s568_s1 + $0x128] sm:$0xff]  ;;  %v321_v29 = vpack.c.bf16 %v25_v22, %v24_v21  ;;  %v323_v30 = vpack.c.bf16 %v43_v26, %v42_v25  ;;  %v26_v31 = vld [vmem:[%s568_s1 + $0x30] sm:$0xff] }
   0x8   :  { %346 = vmatprep.subr.bf16.mxu1 %v370_v3  ;;  %v27_v32 = vld [vmem:[%s568_s1 + $0x38] sm:$0xff]  ;;  %v350_v33 = vpack.c.bf16 %v57_v28, %v56_v27  ;;  %v44_v34 = vld [vmem:[%s568_s1 + $0xc0] sm:$0xff]  ;;  %v45_v35 = vld [vmem:[%s568_s1 + $0xc8] sm:$0xff] }
   0x9   :  { %318 = vmatpush3.bf16.msra.mxu0 %v317_v17  ;;  %v58_v36 = vld [vmem:[%s568_s1 + $0x130] sm:$0xff]  ;;  %v59_v37 = vld [vmem:[%s568_s1 + $0x138] sm:$0xff]  ;;  %v325_v38 = vpack.c.bf16 %v27_v32, %v26_v31  ;;  %v327_v39 = vpack.c.bf16 %v45_v35, %v44_v34  ;;  %v28_v40 = vld [vmem:[%s568_s1 + $0x40] sm:$0xff] }
   0xa   :  { %320 = vmatprep.subr.bf16.mxu0 %v319_v20  ;;  %v29_v41 = vld [vmem:[%s568_s1 + $0x48] sm:$0xff]  ;;  %v353_v42 = vpack.c.bf16 %v59_v37, %v58_v36  ;;  %v46_v43 = vld [vmem:[%s568_s1 + $0xd0] sm:$0xff]  ;;  %v47_v44 = vld [vmem:[%s568_s1 + $0xd8] sm:$0xff] }
   0xb   :  { %348 = vmatpush3.bf16.msra.mxu1 %v347_v24  ;;  %v60_v45 = vld [vmem:[%s568_s1 + $0x140] sm:$0xff]  ;;  %v61_v46 = vld [vmem:[%s568_s1 + $0x148] sm:$0xff]  ;;  %v329_v48 = vpack.c.bf16 %v29_v41, %v28_v40  ;;  %v331_v49 = vpack.c.bf16 %v47_v44, %v46_v43  ;;  %v30_v50 = vld [vmem:[%s568_s1 + $0x50] sm:$0xff] }
   0xc   :  { %349 = vmatprep.subr.bf16.mxu1 %v370_v3  ;;  %v18_v47 = vld [vmem:[%s569_s0 + $0x8] sm:$0xff]  ;;  %v31_v51 = vld [vmem:[%s568_s1 + $0x58] sm:$0xff]  ;;  %v356_v52 = vpack.c.bf16 %v61_v46, %v60_v45  ;;  %v48_v53 = vld [vmem:[%s568_s1 + $0xe0] sm:$0xff] }
   0xd   :  { %322 = vmatpush3.bf16.msra.mxu0 %v321_v29  ;;  %139 = vmatprep.mubr.f32.mxu0 %v18_v47  ;;  %v49_v54 = vld [vmem:[%s568_s1 + $0xe8] sm:$0xff]  ;;  %v62_v55 = vld [vmem:[%s568_s1 + $0x150] sm:$0xff]  ;;  %v63_v56 = vld [vmem:[%s568_s1 + $0x158] sm:$0xff]  ;;  %v333_v57 = vpack.c.bf16 %v31_v51, %v30_v50 }
   0xe   :  { %324 = vmatprep.subr.bf16.mxu0 %v323_v30  ;;  %v335_v58 = vpack.c.bf16 %v49_v54, %v48_v53  ;;  %v32_v59 = vld [vmem:[%s568_s1 + $0x60] sm:$0xff]  ;;  %v33_v60 = vld [vmem:[%s568_s1 + $0x68] sm:$0xff]  ;;  %v359_v61 = vpack.c.bf16 %v63_v56, %v62_v55  ;;  %v50_v62 = vld [vmem:[%s568_s1 + $0xf0] sm:$0xff] }
   0xf   :  { %351 = vmatpush3.bf16.msra.mxu1 %v350_v33  ;;  %v51_v63 = vld [vmem:[%s568_s1 + $0xf8] sm:$0xff]  ;;  %v64_v0 = vld [vmem:[%s568_s1 + $0x160] sm:$0xff]  ;;  %v65_v1 = vld [vmem:[%s568_s1 + $0x168] sm:$0xff]  ;;  %v337_v2 = vpack.c.bf16 %v33_v60, %v32_v59 }
  0x10   :  { %352 = vmatprep.subr.bf16.mxu1 %v370_v3  ;;  %v339_v4 = vpack.c.bf16 %v51_v63, %v50_v62  ;;  %v34_v5 = vld [vmem:[%s568_s1 + $0x70] sm:$0xff]  ;;  %v35_v6 = vld [vmem:[%s568_s1 + $0x78] sm:$0xff]  ;;  %v362_v7 = vpack.c.bf16 %v65_v1, %v64_v0  ;;  %v17_v12 = vld [vmem:[%s569_s0] sm:$0xff] }
  0x11   :  { %326 = vmatpush3.bf16.msra.mxu0 %v325_v38  ;;  %v66_v8 = vld [vmem:[%s568_s1 + $0x170] sm:$0xff]  ;;  %v67_v9 = vld [vmem:[%s568_s1 + $0x178] sm:$0xff]  ;;  %v341_v10 = vpack.c.bf16 %v35_v6, %v34_v5  ;;  %v223_v16 = vld [vmem:[%s570_s2] ss:$0 sm:$0xff] }
  0x12   :  { %328 = vmatprep.subr.bf16.mxu0 %v327_v39  ;;  %v365_v11 = vpack.c.bf16 %v67_v9, %v66_v8  ;;  %v19_v13 = vld [vmem:[%s569_s0 + $0x10] sm:$0xff]  ;;  %v215_v20 = vld [vmem:[%s571_s3] sm:$0xff] }
  0x13   :  { %354 = vmatpush3.bf16.msra.mxu1 %v353_v42 }
  0x14   :  { %355 = vmatprep.subr.bf16.mxu1 %v370_v3 }
  0x15   :  { %330 = vmatpush3.bf16.msra.mxu0 %v329_v48 }
  0x16   :  { %332 = vmatprep.subr.bf16.mxu0 %v331_v49 }
  0x17   :  { %357 = vmatpush3.bf16.msra.mxu1 %v356_v52 }
  0x18   :  { %358 = vmatprep.subr.bf16.mxu1 %v370_v3 }
  0x19   :  { %334 = vmatpush3.bf16.msra.mxu0 %v333_v57 }
  0x1a   :  { %336 = vmatprep.subr.bf16.mxu0 %v335_v58 }
  0x1b   :  { %360 = vmatpush3.bf16.msra.mxu1 %v359_v61 }
  0x1c   :  { %361 = vmatprep.subr.bf16.mxu1 %v370_v3 }
  0x1d   :  { %338 = vmatpush3.bf16.msra.mxu0 %v337_v2 }
  0x1e   :  { %340 = vmatprep.subr.bf16.mxu0 %v339_v4 }
  0x1f   :  { %363 = vmatpush3.bf16.msra.mxu1 %v362_v7 }
  0x20   :  { %364 = vmatprep.subr.bf16.mxu1 %v370_v3 }
  0x21   :  { %342 = vmatpush3.bf16.msra.mxu0 %v341_v10 }
  0x23   :  { %366 = vmatpush3.bf16.msra.mxu1 %v365_v11 }
  0x24   :  { %140 = vmatmul.mubr.f32.vlgmr.msra.gmra.mrb[0].mxu0 %v17_v12 }
  0x26   :  { %309 = vmatmul.mubr.f32.vlgmr.msra.gmra.mrb[0].mxu1 %v19_v13 }
  0xf7   :  { %v256_v14 = vpop.f32.mrb[0].mxu0 }
  0xf8   :  { %v257_v15 = vpop.f32.mrb[1].mxu0 }
  0xf9   :  { %v258_v17 = vadd.f32 %v257_v15, %v256_v14  ;;  %v211_v3 = vpop.f32.mrb[0].mxu1 }
  0xfa   :  { %v310_v18 = vpop.f32.mrb[1].mxu1 }
  0xfb   :  { %v142_v19 = vadd.f32 %v258_v17, %v223_v16 }
  0xfd   :  { %v212_v21 = vadd.f32 %v211_v3, %v142_v19 }
  0xff   :  { %v216_v22 = vadd.f32 %v215_v20, %v212_v21 }
 0x101   :  { %v217_v23 = vmax.f32 %v216_v22, 0.0 }
 0x103   :  { %218 = vst [vmem:[%s572_s4] sm:$0xff] %v217_v23 }

// kernel: _lambda_.23
= control target key start
LH: loop header
LB: loop body
LE: loop exit
PB: predicated region body
PF: predicated region fallthrough
CT: control target
= control target key end

     0   :  { %v406_v7 = vmov 0.0|0.0   ;;  %vm407_vm0 = vmmov 0   ;;  %v408_v8 = vmov 0.0   ;;  %s614_s0 = inlined_call_operand.vmem [shape: f32[8,384], index: 0, kind: input, shape index: {}]   ;;  %s615_s1 = inlined_call_operand.vmem [shape: f32[384,128], index: 1, kind: input, shape index: {}]   ;;  %s616_s2 = inlined_call_operand.vmem [shape: f32[1,128], index: 2, kind: input, shape index: {}]   ;;  %s617_s3 = inlined_call_operand.vmem [shape: f32[8,128], index: 3, kind: input, shape index: {}]   ;;  %s618_s4 = inlined_call_operand.hbm [shape: f32[8,128], index: 4, kind: output, shape index: {}]  }
   0x1   :  { %v37_v0 = vld [vmem:[%s615_s1 + $0x80] sm:$0xff]  ;;  %v38_v1 = vld [vmem:[%s615_s1 + $0x88] sm:$0xff]  ;;  %v39_v5 = vld [vmem:[%s615_s1 + $0x90] sm:$0xff]  ;;  %354 = vmatprep.subr.bf16.mxu1 %v406_v7  ;;  %319 = vmatprep.mubr.msk.f32.mxu1 %vm407_vm0, %v408_v8 }
   0x2   :  { %v21_v2 = vld [vmem:[%s615_s1] sm:$0xff]  ;;  %v322_v3 = vpack.c.bf16 %v38_v1, %v37_v0  ;;  %v22_v4 = vld [vmem:[%s615_s1 + $0x8] sm:$0xff]  ;;  %v40_v6 = vld [vmem:[%s615_s1 + $0x98] sm:$0xff] }
   0x3   :  { %v324_v9 = vpack.c.bf16 %v22_v4, %v21_v2  ;;  %v326_v10 = vpack.c.bf16 %v40_v6, %v39_v5  ;;  %v23_v11 = vld [vmem:[%s615_s1 + $0x10] sm:$0xff]  ;;  %v24_v12 = vld [vmem:[%s615_s1 + $0x18] sm:$0xff]  ;;  %v53_v13 = vld [vmem:[%s615_s1 + $0x100] sm:$0xff] }
   0x4   :  { %323 = vmatprep.subr.bf16.mxu0 %v322_v3  ;;  %v54_v14 = vld [vmem:[%s615_s1 + $0x108] sm:$0xff]  ;;  %v41_v15 = vld [vmem:[%s615_s1 + $0xa0] sm:$0xff]  ;;  %v328_v17 = vpack.c.bf16 %v24_v12, %v23_v11  ;;  %v55_v19 = vld [vmem:[%s615_s1 + $0x110] sm:$0xff] }
   0x5   :  { %v42_v16 = vld [vmem:[%s615_s1 + $0xa8] sm:$0xff]  ;;  %325 = vmatpush3.bf16.msra.mxu0 %v324_v9  ;;  %v355_v18 = vpack.c.bf16 %v54_v14, %v53_v13  ;;  %v25_v21 = vld [vmem:[%s615_s1 + $0x20] sm:$0xff]  ;;  %v56_v23 = vld [vmem:[%s615_s1 + $0x118] sm:$0xff] }
   0x6   :  { %327 = vmatprep.subr.bf16.mxu0 %v326_v10  ;;  %v330_v20 = vpack.c.bf16 %v42_v16, %v41_v15  ;;  %v26_v22 = vld [vmem:[%s615_s1 + $0x28] sm:$0xff]  ;;  %v358_v24 = vpack.c.bf16 %v56_v23, %v55_v19  ;;  %v43_v25 = vld [vmem:[%s615_s1 + $0xb0] sm:$0xff]  ;;  %v44_v26 = vld [vmem:[%s615_s1 + $0xb8] sm:$0xff] }
   0x7   :  { %356 = vmatpush3.bf16.msra.mxu1 %v355_v18  ;;  %v57_v27 = vld [vmem:[%s615_s1 + $0x120] sm:$0xff]  ;;  %v58_v28 = vld [vmem:[%s615_s1 + $0x128] sm:$0xff]  ;;  %v332_v29 = vpack.c.bf16 %v26_v22, %v25_v21  ;;  %v334_v30 = vpack.c.bf16 %v44_v26, %v43_v25  ;;  %v27_v31 = vld [vmem:[%s615_s1 + $0x30] sm:$0xff] }
   0x8   :  { %357 = vmatprep.subr.bf16.mxu1 %v406_v7  ;;  %v28_v32 = vld [vmem:[%s615_s1 + $0x38] sm:$0xff]  ;;  %v361_v33 = vpack.c.bf16 %v58_v28, %v57_v27  ;;  %v45_v34 = vld [vmem:[%s615_s1 + $0xc0] sm:$0xff]  ;;  %v46_v35 = vld [vmem:[%s615_s1 + $0xc8] sm:$0xff] }
   0x9   :  { %329 = vmatpush3.bf16.msra.mxu0 %v328_v17  ;;  %v59_v36 = vld [vmem:[%s615_s1 + $0x130] sm:$0xff]  ;;  %v60_v37 = vld [vmem:[%s615_s1 + $0x138] sm:$0xff]  ;;  %v336_v38 = vpack.c.bf16 %v28_v32, %v27_v31  ;;  %v338_v39 = vpack.c.bf16 %v46_v35, %v45_v34  ;;  %v29_v40 = vld [vmem:[%s615_s1 + $0x40] sm:$0xff] }
   0xa   :  { %331 = vmatprep.subr.bf16.mxu0 %v330_v20  ;;  %v30_v41 = vld [vmem:[%s615_s1 + $0x48] sm:$0xff]  ;;  %v364_v42 = vpack.c.bf16 %v60_v37, %v59_v36  ;;  %v47_v43 = vld [vmem:[%s615_s1 + $0xd0] sm:$0xff]  ;;  %v48_v44 = vld [vmem:[%s615_s1 + $0xd8] sm:$0xff] }
   0xb   :  { %359 = vmatpush3.bf16.msra.mxu1 %v358_v24  ;;  %v61_v45 = vld [vmem:[%s615_s1 + $0x140] sm:$0xff]  ;;  %v62_v46 = vld [vmem:[%s615_s1 + $0x148] sm:$0xff]  ;;  %v340_v48 = vpack.c.bf16 %v30_v41, %v29_v40  ;;  %v342_v49 = vpack.c.bf16 %v48_v44, %v47_v43  ;;  %v31_v50 = vld [vmem:[%s615_s1 + $0x50] sm:$0xff] }
   0xc   :  { %360 = vmatprep.subr.bf16.mxu1 %v406_v7  ;;  %v19_v47 = vld [vmem:[%s614_s0 + $0x8] sm:$0xff]  ;;  %v32_v51 = vld [vmem:[%s615_s1 + $0x58] sm:$0xff] }
   0xd   :  { %333 = vmatpush3.bf16.msra.mxu0 %v332_v29  ;;  %140 = vmatprep.mubr.f32.mxu0 %v19_v47 }
   0xe   :  { %335 = vmatprep.subr.bf16.mxu0 %v334_v30 }
   0xf   :  { %362 = vmatpush3.bf16.msra.mxu1 %v361_v33 }
  0x10   :  { %363 = vmatprep.subr.bf16.mxu1 %v406_v7 }
  0x11   :  { %337 = vmatpush3.bf16.msra.mxu0 %v336_v38 }
  0x12   :  { %339 = vmatprep.subr.bf16.mxu0 %v338_v39 }
  0x13   :  { %9 = vsyncpa [#allocation3], 0  ;;  %365 = vmatpush3.bf16.msra.mxu1 %v364_v42  ;;  %v367_v52 = vpack.c.bf16 %v62_v46, %v61_v45  ;;  %v49_v53 = vld [vmem:[%s615_s1 + $0xe0] sm:$0xff]  ;;  %v50_v54 = vld [vmem:[%s615_s1 + $0xe8] sm:$0xff]  ;;  %v344_v57 = vpack.c.bf16 %v32_v51, %v31_v50  ;;  %s409_s16 = smov [#allocation2]  }
  0x14   :  { %366 = vmatprep.subr.bf16.mxu1 %v406_v7  ;;  %v63_v55 = vld [vmem:[%s615_s1 + $0x150] sm:$0xff]  ;;  %v64_v56 = vld [vmem:[%s615_s1 + $0x158] sm:$0xff]  ;;  %v346_v58 = vpack.c.bf16 %v50_v54, %v49_v53  ;;  %v33_v59 = vld [vmem:[%s615_s1 + $0x60] sm:$0xff]  ;;  %s226_s17 = sshll.u32 %s409_s16, 4  ;;  %s227_s17 = int_to_ptr.vmem [resolvable:$true] %s226_s17 }
  0x15   :  { %341 = vmatpush3.bf16.msra.mxu0 %v340_v48  ;;  %v34_v60 = vld [vmem:[%s615_s1 + $0x68] sm:$0xff]  ;;  %v370_v61 = vpack.c.bf16 %v64_v56, %v63_v55  ;;  %v51_v62 = vld [vmem:[%s615_s1 + $0xf0] sm:$0xff]  ;;  %v52_v63 = vld [vmem:[%s615_s1 + $0xf8] sm:$0xff]  ;;  %p387_p1 = scmp.lt.s32.totalorder %s227_s17, %s227_s17 }
  0x16   :  { %343 = vmatprep.subr.bf16.mxu0 %v342_v49  ;;  %v65_v0 = vld [vmem:[%s615_s1 + $0x160] sm:$0xff]  ;;  %v66_v1 = vld [vmem:[%s615_s1 + $0x168] sm:$0xff]  ;;  %v348_v2 = vpack.c.bf16 %v34_v60, %v33_v59  ;;  %v350_v3 = vpack.c.bf16 %v52_v63, %v51_v62  ;;  %v35_v4 = vld [vmem:[%s615_s1 + $0x70] sm:$0xff] }
  0x17   :  { %368 = vmatpush3.bf16.msra.mxu1 %v367_v52  ;;  %v36_v5 = vld [vmem:[%s615_s1 + $0x78] sm:$0xff]  ;;  %v373_v6 = vpack.c.bf16 %v66_v1, %v65_v0  ;;  %v67_v8 = vld [vmem:[%s615_s1 + $0x170] sm:$0xff]  ;;  %v18_v12 = vld [vmem:[%s614_s0] sm:$0xff] }
  0x18   :  { %369 = vmatprep.subr.bf16.mxu1 %v406_v7  ;;  %v68_v9 = vld [vmem:[%s615_s1 + $0x178] sm:$0xff]  ;;  %v352_v10 = vpack.c.bf16 %v36_v5, %v35_v4  ;;  %v20_v13 = vld [vmem:[%s614_s0 + $0x10] sm:$0xff]  ;;  %v234_v16 = vld [vmem:[%s616_s2] ss:$0 sm:$0xff]  ;;  %s382_s0 = scalar_lea.vmem %s227_s17, 128 }
  0x19   :  { %345 = vmatpush3.bf16.msra.mxu0 %v344_v57  ;;  %v376_v11 = vpack.c.bf16 %v68_v9, %v67_v8  ;;  %v216_v20 = vld [vmem:[%s617_s3] sm:$0xff]  ;;  %p383_p0 = scmp.ne.s32.totalorder %s227_s17, %s382_s0  ;;  %p388_p2 = scmp.lt.s32.totalorder %s382_s0, %s382_s0 }
  0x1a   :  { %347 = vmatprep.subr.bf16.mxu0 %v346_v58 }
  0x1b   :  { %371 = vmatpush3.bf16.msra.mxu1 %v370_v61  ;;  %p389_p3 = por %p388_p2, %p387_p1 }
  0x1c   :  { %372 = vmatprep.subr.bf16.mxu1 %v406_v7 }
  0x1d   :  { %349 = vmatpush3.bf16.msra.mxu0 %v348_v2  ;;  %p390_p4 = pnand %p389_p3, %p383_p0 }
  0x1e   :  { %351 = vmatprep.subr.bf16.mxu0 %v350_v3 }
  0x1f   :  { %374 = vmatpush3.bf16.msra.mxu1 %v373_v6 }
  0x20   :  { %375 = vmatprep.subr.bf16.mxu1 %v406_v7 }
  0x21   :  { %353 = vmatpush3.bf16.msra.mxu0 %v352_v10 }
  0x23   :  { %377 = vmatpush3.bf16.msra.mxu1 %v376_v11 }
  0x24   :  { %141 = vmatmul.mubr.f32.vlgmr.msra.gmra.mrb[0].mxu0 %v18_v12 }
  0x26   :  { %320 = vmatmul.mubr.f32.vlgmr.msra.gmra.mrb[0].mxu1 %v20_v13 }
  0xf7   :  { %v267_v14 = vpop.f32.mrb[0].mxu0 }
  0xf8   :  { %v268_v15 = vpop.f32.mrb[1].mxu0 }
  0xf9   :  { %v269_v17 = vadd.f32 %v268_v15, %v267_v14  ;;  %v212_v7 = vpop.f32.mrb[0].mxu1 }
  0xfa   :  { %v321_v18 = vpop.f32.mrb[1].mxu1 }
  0xfb   :  { %v143_v19 = vadd.f32 %v269_v17, %v234_v16 }
  0xfd   :  { %v213_v21 = vadd.f32 %v212_v7, %v143_v19 }
  0xff   :  { %v217_v22 = vadd.f32 %v216_v20, %v213_v21 }
 0x101   :  { %v218_v23 = vmax.f32 %v217_v22, 0.0 }
 0x103   :  { %219 = vst [vmem:[#allocation2] sm:$0xff] %v218_v23 }
 0x104   :  { %393 = shalt.err (!%p390_p4)
}
 0x105   :  { %s394_s19 = scalar_lea.hbm %s618_s4, 128 }
 0x106   :  { %p395_p5 = scmp.ne.s32.totalorder %s618_s4, %s394_s19  ;;  %p398_p6 = scmp.lt.u32.totalorder %s394_s19, %s618_s4 }
 0x108   :  { %p400_p7 = pnand %p398_p6, %p395_p5 }
 0x10a   :  { %403 = shalt.err (!%p400_p7)
}
 0x10b   :  { %229 = dma.vmem_to_hbm [thread:$0]  %s227_s17, 128, %s618_s4, [#allocation3]  }
 0x10c   :  { %404 = dma.done.wait [#allocation3], 128  }
 0x10d   :  { %405 = vsyncadd [#allocation3], 4294967168 }
 0x10e   :  { %233 = vsyncpa [#allocation3], 1 }

</bundles_post_ra>
